<compile_context>
chip_gen: v5e
topology: v5e:2x2
jax: 0.10.0
libtpu: 0.0.40
codegen_flags: <defaults>
</compile_context>

<pallas_src>
import functools

import jax
import jax.numpy as jnp
from jax import lax
from jax.experimental import pallas as pl
from jax.experimental.pallas import tpu as pltpu


# ----------------------------------------------------------------------------
# Generation-aware VMEM budgets
# ----------------------------------------------------------------------------
_VMEM_LIMIT_CACHE = None


def _vmem_limit_bytes():
    """~3/4 of physical VMEM (128 MiB on v5e/v6e, 64 MiB on v7x)."""
    global _VMEM_LIMIT_CACHE
    if _VMEM_LIMIT_CACHE is None:
        cap = 64 << 20                                    # safe floor (v7x)
        try:
            info = pltpu.get_tpu_info()
            cap = int(getattr(info, "vmem_capacity_bytes", cap) or cap)
        except Exception:
            pass
        _VMEM_LIMIT_CACHE = min((cap * 3) // 4, 100 << 20)
    return _VMEM_LIMIT_CACHE


def _conv_budget_bytes():
    return min(_vmem_limit_bytes() * 6 // 10, 48 << 20)


def _l1_budget_bytes():
    return min(_vmem_limit_bytes() * 6 // 10, 32 << 20)


# ----------------------------------------------------------------------------
# Pallas kernels
# ----------------------------------------------------------------------------
def _conv3x3_relu_kernel(x_ref, top_ref, bot_ref, w_ref, b_ref, *out_refs, pool):
    """3x3 'same' conv + bias + ReLU (+ optional fused 2x2 max-pool), one row tile.

    x_ref:   (TR, W, Cin)  bf16 rows [r*TR, r*TR+TR) of the UNPADDED image
    top_ref: (1,  W, Cin)  bf16 row  r*TR-1 (clamped; zero-masked when r == 0)
    bot_ref: (1,  W, Cin)  bf16 row  r*TR+TR (clamped; zero-masked at last block)
    w_ref:   (3, 3, Cin, Cout) bf16
    b_ref:   (1, Cout) f32
    out_refs[0]: (TR, W, Cout) bf16
    out_refs[1]: (TR//2, W//2, Cout) bf16      (only when pool=True)
    """
    o_ref = out_refs[0]
    TR, W, Cout = o_ref.shape
    Cin = x_ref.shape[-1]
    r = pl.program_id(1)
    nR = pl.num_programs(1)

    tv = top_ref[...]
    tv = jnp.where(r > 0, tv, jnp.zeros_like(tv))
    bv = bot_ref[...]
    bv = jnp.where(r < nR - 1, bv, jnp.zeros_like(bv))

    xfull = jnp.concatenate([tv, x_ref[...], bv], axis=0)          # (TR+2, W, Cin)
    zcol = jnp.zeros((TR + 2, 1, Cin), dtype=xfull.dtype)
    xp = jnp.concatenate([zcol, xfull, zcol], axis=1)              # (TR+2, W+2, Cin)

    acc = None                                                     # local f32 acc
    for dy in range(3):
        for dx in range(3):
            slab = xp[dy:dy + TR, dx:dx + W, :].reshape(TR * W, Cin)
            part = jnp.dot(slab, w_ref[dy, dx],
                           preferred_element_type=jnp.float32)
            acc = part if acc is None else acc + part

    out = jnp.maximum(acc + b_ref[...], 0.0)                       # (TR*W, Cout) f32
    o3 = out.reshape(TR, W, Cout)
    o_ref[...] = o3.astype(o_ref.dtype)
    if pool:
        p_ref = out_refs[1]
        p = jnp.max(o3.reshape(TR, W // 2, 2, Cout), axis=2)       # pool width
        p = jnp.max(p.reshape(TR // 2, 2, W // 2, Cout), axis=1)   # pool height
        p_ref[...] = p.astype(p_ref.dtype)


def _l1_group_sums_kernel(f_ref, *acc_refs, out_group, cmp_groups):
    """One row tile of all feature groups; accumulate sum|out - g| per comparand.

    f_ref:    (G, TR, K) bf16 — every group read exactly once per row tile.
    acc_refs: (1, 1) f32 resident accumulators, one per comparand.
    """
    @pl.when(pl.program_id(0) == 0)
    def _():
        for a in acc_refs:
            a[...] = jnp.zeros_like(a)

    base = f_ref[out_group].astype(jnp.float32)                    # (TR, K)
    for j, g in enumerate(cmp_groups):
        d = jnp.abs(base - f_ref[g].astype(jnp.float32))
        acc_refs[j][...] += jnp.sum(d, axis=(0, 1), keepdims=True)


# ----------------------------------------------------------------------------
# Tile pickers (cost models include double-buffering + in-kernel temporaries)
# ----------------------------------------------------------------------------
def _pick_conv_row_tile(H, W, Cin, Cout, budget):
    divs = [d for d in range(H, 0, -1) if H % d == 0 and d % 2 == 0]
    if not divs:
        return H

    def cost(tr):
        xin = tr * W * Cin * 2
        halo = 2 * W * Cin * 2
        wgt = 9 * Cin * Cout * 2
        xout = tr * W * Cout * 2
        pout = (tr // 2) * (W // 2) * Cout * 2
        tmp = 2 * (tr + 2) * (W + 2) * Cin * 2 + tr * W * Cout * 4
        return 2 * (xin + halo + wgt + xout + pout) + tmp          # x2: double buffer

    for tr in divs:
        if cost(tr) <= budget:
            return tr
    return divs[-1]


def _pick_lane_width(total, C):
    for k in (1024, 512, 256, 128):
        if total % k == 0:
            return k
    return C


def _pick_l1_row_tile(rows, G, K, budget):
    cap = max(8, budget // (2 * G * K * 2))                        # double-buffered
    if rows <= cap:
        return rows
    for tr in range(min(rows - 1, cap), 7, -1):
        if rows % tr == 0 and tr % 8 == 0:
            return tr
    return rows


# ----------------------------------------------------------------------------
# Wrappers
# ----------------------------------------------------------------------------
def conv3x3_relu(x, w, b, *, pool=False, row_tile=None):
    """x:(B,H,W,Cin) -> (B,H,W,Cout) bf16 [, (B,H/2,W/2,Cout) bf16 fused max-pool]."""
    B, H, W, Cin = x.shape
    Cout = w.shape[-1]
    assert H % 2 == 0 and W % 2 == 0, "even H, W required"  # TODO(synk): odd sizes
    xb = x.astype(jnp.bfloat16)
    wb = w.astype(jnp.bfloat16)
    if Cin < 8:                                   # conv1_1: pad 3 -> 8 lanes (cheap)
        pad_c = 8 - Cin
        xb = jnp.pad(xb, ((0, 0), (0, 0), (0, 0), (0, pad_c)))
        wb = jnp.pad(wb, ((0, 0), (0, 0), (0, pad_c), (0, 0)))
        Cin = 8
    b2 = b.reshape(1, Cout).astype(jnp.float32)

    TR = row_tile if row_tile is not None else _pick_conv_row_tile(
        H, W, Cin, Cout, _conv_budget_bytes())
    assert H % TR == 0 and TR % 2 == 0
    nR = H // TR

    out_shape = [jax.ShapeDtypeStruct((B, H, W, Cout), jnp.bfloat16)]
    out_specs = [pl.BlockSpec((None, TR, W, Cout), lambda ib, ir: (ib, ir, 0, 0))]
    if pool:
        out_shape.append(
            jax.ShapeDtypeStruct((B, H // 2, W // 2, Cout), jnp.bfloat16))
        out_specs.append(
            pl.BlockSpec((None, TR // 2, W // 2, Cout), lambda ib, ir: (ib, ir, 0, 0)))

    return pl.pallas_call(
        functools.partial(_conv3x3_relu_kernel, pool=pool),
        out_shape=tuple(out_shape) if pool else out_shape[0],
        grid=(B, nR),
        in_specs=[
            pl.BlockSpec((None, TR, W, Cin), lambda ib, ir: (ib, ir, 0, 0)),
            # clamped 1-row halos just above / below the main block
            pl.BlockSpec((None, 1, W, Cin),
                         lambda ib, ir: (ib, jnp.maximum(ir * TR - 1, 0), 0, 0)),
            pl.BlockSpec((None, 1, W, Cin),
                         lambda ib, ir: (ib, jnp.minimum(ir * TR + TR, H - 1), 0, 0)),
            pl.BlockSpec((3, 3, Cin, Cout), lambda ib, ir: (0, 0, 0, 0)),
            pl.BlockSpec((1, Cout), lambda ib, ir: (0, 0)),
        ],
        out_specs=tuple(out_specs) if pool else out_specs[0],
        compiler_params=pltpu.CompilerParams(
            dimension_semantics=("parallel", "parallel"),
            vmem_limit_bytes=_vmem_limit_bytes()),
    )(xb, xb, xb, wb, b2)


def l1_group_sums(feat, n_groups, cmp_groups, *, out_group=2, row_tile=None):
    """feat:(n_groups*B,H,W,C). Returns [sum|feat[out]-feat[g]| for g in cmp_groups]."""
    G = n_groups
    total = feat.size // G
    K = _pick_lane_width(total, feat.shape[-1])
    rows = total // K
    f3 = feat.reshape(G, rows, K)
    TR = row_tile if row_tile is not None else _pick_l1_row_tile(
        rows, G, K, _l1_budget_bytes())
    assert rows % TR == 0

    out_shape = tuple(jax.ShapeDtypeStruct((1, 1), jnp.float32) for _ in cmp_groups)
    out_specs = tuple(pl.BlockSpec((1, 1), lambda i: (0, 0)) for _ in cmp_groups)
    sums = pl.pallas_call(
        functools.partial(_l1_group_sums_kernel,
                          out_group=out_group, cmp_groups=tuple(cmp_groups)),
        out_shape=out_shape,
        grid=(rows // TR,),
        in_specs=[pl.BlockSpec((G, TR, K), lambda i: (0, i, 0))],
        out_specs=out_specs,
        compiler_params=pltpu.CompilerParams(
            dimension_semantics=("arbitrary",),
            vmem_limit_bytes=_vmem_limit_bytes()),
    )(f3)
    return [s[0, 0] for s in sums]


# ----------------------------------------------------------------------------
# VGG16.features[:16]  (frozen; He-init stand-ins for the pretrained weights)
# ----------------------------------------------------------------------------
_VGG_CFG = [(3, 64), (64, 64),                      # conv1_1, conv1_2 -> relu1_2
            (64, 128), (128, 128),                  # conv2_1, conv2_2 -> relu2_2
            (128, 256), (256, 256), (256, 256)]     # conv3_1..3_3     -> relu3_3


def init_vgg_params(key):
    # TODO(synk): pretrained VGG16 weights are not loaded; deterministic stand-ins.
    params = []
    for cin, cout in _VGG_CFG:
        key, kw = jax.random.split(key)
        scale = (2.0 / (9.0 * cin)) ** 0.5
        w = scale * jax.random.normal(kw, (3, 3, cin, cout), jnp.float32)
        b = jnp.zeros((cout,), jnp.float32)
        params.append((w, b))
    return params


def vgg_features(x_nhwc, params):
    """Returns [relu1_2, relu2_2, relu3_3] (NHWC, bf16); pools fused into convs."""
    x = conv3x3_relu(x_nhwc, *params[0])                 # conv1_1
    f1, x = conv3x3_relu(x, *params[1], pool=True)       # conv1_2 -> relu1_2 (+pool)
    x = conv3x3_relu(x, *params[2])                      # conv2_1
    f2, x = conv3x3_relu(x, *params[3], pool=True)       # conv2_2 -> relu2_2 (+pool)
    x = conv3x3_relu(x, *params[4])                      # conv3_1
    x = conv3x3_relu(x, *params[5])                      # conv3_2
    f3 = conv3x3_relu(x, *params[6])                     # conv3_3 -> relu3_3
    return [f1, f2, f3]


# ----------------------------------------------------------------------------
# ContrastLoss.forward
# ----------------------------------------------------------------------------
def contrast_loss(inp, pos, neg, out, params):
    """inp, pos, out: (B, 3, H, W) NCHW;  neg: (B, N, 3, H, W).  Forward value."""
    N = neg.shape[1]
    to_nhwc = lambda t: jnp.transpose(t, (0, 2, 3, 1)).astype(jnp.float32)

    # Single batched VGG pass over [inp, pos, out, neg_0, ..., neg_{N-1}].
    stacked = jnp.concatenate([inp, pos, out] + [neg[:, j] for j in range(N)],
                              axis=0)
    feats = vgg_features(to_nhwc(stacked), params)

    G = N + 3
    cmp_groups = (0, 1) + tuple(3 + j for j in range(N))   # inp, pos, neg_j
    # TODO(synk): .detach() affects gradients only; omitted for the forward value.
    loss = jnp.float32(0.0)
    for f in feats:
        n_elems = f.size // G
        sums = l1_group_sums(f, G, cmp_groups)              # one kernel per level
        inp_term = (sums[0] / n_elems) / (N + 1)
        pos_term = sums[1] / n_elems
        neg_term = sum(sums[2 + j] / n_elems for j in range(N)) / (N + 1)
        loss = loss + pos_term / (inp_term + neg_term + 1e-7)
    return loss / len(feats)


# ----------------------------------------------------------------------------
# Pure-JAX reference (matches the kernels' bf16 quantization points)
# ----------------------------------------------------------------------------
def _ref_conv3x3_relu(x, w, b):
    y = lax.conv_general_dilated(
        x.astype(jnp.bfloat16), w.astype(jnp.bfloat16),
        window_strides=(1, 1), padding=((1, 1), (1, 1)),
        dimension_numbers=("NHWC", "HWIO", "NHWC"),
        preferred_element_type=jnp.float32)
    return jnp.maximum(y + b.reshape(1, 1, 1, -1).astype(jnp.float32),
                       0.0).astype(jnp.bfloat16)


def _ref_pool(x):
    B, H, W, C = x.shape
    return jnp.max(x.reshape(B, H // 2, 2, W // 2, 2, C), axis=(2, 4))


def _ref_vgg_features(x, params):
    feats = []
    x = _ref_conv3x3_relu(x, *params[0])
    x = _ref_conv3x3_relu(x, *params[1]); feats.append(x); x = _ref_pool(x)
    x = _ref_conv3x3_relu(x, *params[2])
    x = _ref_conv3x3_relu(x, *params[3]); feats.append(x); x = _ref_pool(x)
    x = _ref_conv3x3_relu(x, *params[4])
    x = _ref_conv3x3_relu(x, *params[5])
    x = _ref_conv3x3_relu(x, *params[6]); feats.append(x)
    return feats


def _ref_contrast_loss(inp, pos, neg, out, params):
    to_nhwc = lambda t: jnp.transpose(t, (0, 2, 3, 1)).astype(jnp.float32)
    N = neg.shape[1]
    inp_f = _ref_vgg_features(to_nhwc(inp), params)
    pos_f = _ref_vgg_features(to_nhwc(pos), params)
    out_f = _ref_vgg_features(to_nhwc(out), params)
    neg_f = [_ref_vgg_features(to_nhwc(neg[:, j]), params) for j in range(N)]
    l1 = lambda a, b: jnp.mean(jnp.abs(a.astype(jnp.float32) -
                                       b.astype(jnp.float32)))
    loss = jnp.float32(0.0)
    for i in range(len(out_f)):
        pos_term = l1(out_f[i], pos_f[i])
        inp_term = l1(out_f[i], inp_f[i]) / (N + 1)
        neg_term = sum(l1(out_f[i], neg_f[j][i]) for j in range(N)) / (N + 1)
        loss = loss + pos_term / (inp_term + neg_term + 1e-7)
    return loss / len(out_f)


# ----------------------------------------------------------------------------
if __name__ == "__main__":
    key = jax.random.PRNGKey(0)
    kp, k1, k2, k3, k4, k5, k6, k7, k8 = jax.random.split(key, 9)
    params = init_vgg_params(kp)

    # 1) conv + fused pool with several row blocks (exercises halo clamp/mask).
    xc = jax.random.normal(k5, (2, 16, 16, 32), jnp.float32).astype(jnp.bfloat16)
    wc = 0.1 * jax.random.normal(k6, (3, 3, 32, 64), jnp.float32)
    bc = 0.01 * jax.random.normal(k7, (64,), jnp.float32)
    y_pl, p_pl = conv3x3_relu(xc, wc, bc, pool=True, row_tile=4)
    y_ref = _ref_conv3x3_relu(xc, wc, bc)
    p_ref = _ref_pool(y_ref)
    assert jnp.allclose(y_pl.astype(jnp.float32), y_ref.astype(jnp.float32),
                        rtol=5e-2, atol=5e-2), "conv mismatch"
    assert jnp.allclose(p_pl.astype(jnp.float32), p_ref.astype(jnp.float32),
                        rtol=5e-2, atol=5e-2), "fused pool mismatch"

    # 2) fused multi-comparand L1 with >1 row step (exercises accumulator init).
    Gt, Bt = 5, 2
    feat = jax.random.normal(k8, (Gt * Bt, 8, 8, 64), jnp.float32).astype(jnp.bfloat16)
    groups = (0, 1, 3, 4)
    sums = l1_group_sums(feat, Gt, groups, row_tile=8)
    flat = feat.astype(jnp.float32).reshape(Gt, -1)
    for j, g in enumerate(groups):
        ref = jnp.sum(jnp.abs(flat[2] - flat[g]))
        assert jnp.allclose(sums[j], ref, rtol=1e-4, atol=1e-2), "l1 mismatch"

    # 3) full ContrastLoss forward vs pure-JAX reference.
    B, N, C, H, W = 2, 2, 3, 16, 16
    inp = jax.random.uniform(k1, (B, C, H, W), jnp.float32)
    pos = jax.random.uniform(k2, (B, C, H, W), jnp.float32)
    neg = jax.random.uniform(k3, (B, N, C, H, W), jnp.float32)
    out = jax.random.uniform(k4, (B, C, H, W), jnp.float32)

    loss = jax.jit(contrast_loss)(inp, pos, neg, out, params)
    jax.block_until_ready(loss)
    loss_ref = jax.jit(_ref_contrast_loss)(inp, pos, neg, out, params)
    jax.block_until_ready(loss_ref)

    assert loss.shape == () and bool(jnp.isfinite(loss))
    assert jnp.allclose(loss, loss_ref, rtol=2e-2, atol=1e-3), (loss, loss_ref)
    print("KERNEL_OK")
</pallas_src>

<mosaic_0001>
module attributes {stable_mosaic.version = 11 : i64} {
  func.func @_conv3x3_relu_kernel(%arg0: i32, %arg1: i32, %arg2: memref<1x4x16x32xbf16, #tpu.memory_space<vmem>>, %arg3: memref<1x1x16x32xbf16, #tpu.memory_space<vmem>>, %arg4: memref<1x1x16x32xbf16, #tpu.memory_space<vmem>>, %arg5: memref<3x3x32x64xbf16, #tpu.memory_space<vmem>>, %arg6: memref<1x64xf32, #tpu.memory_space<vmem>>, %arg7: memref<1x4x16x64xbf16, #tpu.memory_space<vmem>>, %arg8: memref<1x2x8x64xbf16, #tpu.memory_space<vmem>>) attributes {dimension_semantics = [#tpu.dimension_semantics<parallel>, #tpu.dimension_semantics<parallel>], iteration_bounds = array<i64: 2, 4>, scalar_prefetch = 0 : i64, scratch_operands = 0 : i64, tpu.core_type = #tpu.core_type<tc>, window_params = [{transform_indices = @transform_0, window_bounds = array<i64: 1, 4, 16, 32>}, {transform_indices = @transform_1, window_bounds = array<i64: 1, 1, 16, 32>}, {transform_indices = @transform_2, window_bounds = array<i64: 1, 1, 16, 32>}, {pipeline_mode = #tpu.pipeline_mode<synchronous>, transform_indices = @transform_3, window_bounds = array<i64: 3, 3, 32, 64>}, {pipeline_mode = #tpu.pipeline_mode<synchronous>, transform_indices = @transform_4, window_bounds = array<i64: 1, 64>}, {transform_indices = @transform_5, window_bounds = array<i64: 1, 4, 16, 64>}, {transform_indices = @transform_6, window_bounds = array<i64: 1, 2, 8, 64>}]} {
    %c0 = arith.constant 0 : index
    %c0_0 = arith.constant 0 : index
    %c0_1 = arith.constant 0 : index
    %c0_2 = arith.constant 0 : index
    %0 = vector.load %arg3[%c0, %c0_0, %c0_1, %c0_2] : memref<1x1x16x32xbf16, #tpu.memory_space<vmem>>, vector<1x1x16x32xbf16>
    %1 = vector.shape_cast %0 : vector<1x1x16x32xbf16> to vector<1x16x32xbf16>
    %c0_i32 = arith.constant 0 : i32
    %2 = arith.cmpi sgt, %arg1, %c0_i32 : i32
    %cst = arith.constant 0.000000e+00 : bf16
    %3 = vector.broadcast %cst : bf16 to vector<1x16x32xbf16>
    %4 = arith.select %2, %1, %3 : vector<1x16x32xbf16>
    %c0_3 = arith.constant 0 : index
    %c0_4 = arith.constant 0 : index
    %c0_5 = arith.constant 0 : index
    %c0_6 = arith.constant 0 : index
    %5 = vector.load %arg4[%c0_3, %c0_4, %c0_5, %c0_6] : memref<1x1x16x32xbf16, #tpu.memory_space<vmem>>, vector<1x1x16x32xbf16>
    %6 = vector.shape_cast %5 : vector<1x1x16x32xbf16> to vector<1x16x32xbf16>
    %c3_i32 = arith.constant 3 : i32
    %7 = arith.cmpi slt, %arg1, %c3_i32 : i32
    %cst_7 = arith.constant 0.000000e+00 : bf16
    %8 = vector.broadcast %cst_7 : bf16 to vector<1x16x32xbf16>
    %9 = arith.select %7, %6, %8 : vector<1x16x32xbf16>
    %c0_8 = arith.constant 0 : index
    %c0_9 = arith.constant 0 : index
    %c0_10 = arith.constant 0 : index
    %c0_11 = arith.constant 0 : index
    %10 = vector.load %arg2[%c0_8, %c0_9, %c0_10, %c0_11] : memref<1x4x16x32xbf16, #tpu.memory_space<vmem>>, vector<1x4x16x32xbf16>
    %11 = vector.shape_cast %10 : vector<1x4x16x32xbf16> to vector<4x16x32xbf16>
    %12 = tpu.concatenate %4, %11, %9 in 0 : vector<1x16x32xbf16>, vector<4x16x32xbf16>, vector<1x16x32xbf16> -> vector<6x16x32xbf16>
    %cst_12 = arith.constant 0.000000e+00 : bf16
    %13 = vector.broadcast %cst_12 : bf16 to vector<6x1x32xbf16>
    %14 = tpu.concatenate %13, %12, %13 in 1 : vector<6x1x32xbf16>, vector<6x16x32xbf16>, vector<6x1x32xbf16> -> vector<6x18x32xbf16>
    %15 = vector.extract_strided_slice %14 {offsets = [0, 0, 0], sizes = [4, 16, 32], strides = [1, 1, 1]} : vector<6x18x32xbf16> to vector<4x16x32xbf16>
    %16 = vector.shape_cast %15 : vector<4x16x32xbf16> to vector<64x32xbf16>
    %c0_13 = arith.constant 0 : index
    %c0_14 = arith.constant 0 : index
    %c0_15 = arith.constant 0 : index
    %c0_16 = arith.constant 0 : index
    %17 = vector.load %arg5[%c0_13, %c0_14, %c0_15, %c0_16] : memref<3x3x32x64xbf16, #tpu.memory_space<vmem>>, vector<1x1x32x64xbf16>
    %18 = vector.shape_cast %17 : vector<1x1x32x64xbf16> to vector<32x64xbf16>
    %cst_17 = arith.constant dense<0.000000e+00> : vector<64x64xf32>
    %19 = tpu.matmul %16, %18, %cst_17 {dimension_numbers = #tpu.dot_dimension_numbers<[1], [0], [0], [1], [0, 0, 1, 1], [], []>} : vector<64x32xbf16>, vector<32x64xbf16>, vector<64x64xf32> -> vector<64x64xf32>
    %20 = vector.extract_strided_slice %14 {offsets = [0, 1, 0], sizes = [4, 16, 32], strides = [1, 1, 1]} : vector<6x18x32xbf16> to vector<4x16x32xbf16>
    %21 = vector.shape_cast %20 : vector<4x16x32xbf16> to vector<64x32xbf16>
    %c0_18 = arith.constant 0 : index
    %c1 = arith.constant 1 : index
    %c0_19 = arith.constant 0 : index
    %c0_20 = arith.constant 0 : index
    %22 = vector.load %arg5[%c0_18, %c1, %c0_19, %c0_20] : memref<3x3x32x64xbf16, #tpu.memory_space<vmem>>, vector<1x1x32x64xbf16>
    %23 = vector.shape_cast %22 : vector<1x1x32x64xbf16> to vector<32x64xbf16>
    %cst_21 = arith.constant dense<0.000000e+00> : vector<64x64xf32>
    %24 = tpu.matmul %21, %23, %cst_21 {dimension_numbers = #tpu.dot_dimension_numbers<[1], [0], [0], [1], [0, 0, 1, 1], [], []>} : vector<64x32xbf16>, vector<32x64xbf16>, vector<64x64xf32> -> vector<64x64xf32>
    %25 = arith.addf %19, %24 : vector<64x64xf32>
    %26 = vector.extract_strided_slice %14 {offsets = [0, 2, 0], sizes = [4, 16, 32], strides = [1, 1, 1]} : vector<6x18x32xbf16> to vector<4x16x32xbf16>
    %27 = vector.shape_cast %26 : vector<4x16x32xbf16> to vector<64x32xbf16>
    %c0_22 = arith.constant 0 : index
    %c2 = arith.constant 2 : index
    %c0_23 = arith.constant 0 : index
    %c0_24 = arith.constant 0 : index
    %28 = vector.load %arg5[%c0_22, %c2, %c0_23, %c0_24] : memref<3x3x32x64xbf16, #tpu.memory_space<vmem>>, vector<1x1x32x64xbf16>
    %29 = vector.shape_cast %28 : vector<1x1x32x64xbf16> to vector<32x64xbf16>
    %cst_25 = arith.constant dense<0.000000e+00> : vector<64x64xf32>
    %30 = tpu.matmul %27, %29, %cst_25 {dimension_numbers = #tpu.dot_dimension_numbers<[1], [0], [0], [1], [0, 0, 1, 1], [], []>} : vector<64x32xbf16>, vector<32x64xbf16>, vector<64x64xf32> -> vector<64x64xf32>
    %31 = arith.addf %25, %30 : vector<64x64xf32>
    %32 = vector.extract_strided_slice %14 {offsets = [1, 0, 0], sizes = [4, 16, 32], strides = [1, 1, 1]} : vector<6x18x32xbf16> to vector<4x16x32xbf16>
    %33 = vector.shape_cast %32 : vector<4x16x32xbf16> to vector<64x32xbf16>
    %c1_26 = arith.constant 1 : index
    %c0_27 = arith.constant 0 : index
    %c0_28 = arith.constant 0 : index
    %c0_29 = arith.constant 0 : index
    %34 = vector.load %arg5[%c1_26, %c0_27, %c0_28, %c0_29] : memref<3x3x32x64xbf16, #tpu.memory_space<vmem>>, vector<1x1x32x64xbf16>
    %35 = vector.shape_cast %34 : vector<1x1x32x64xbf16> to vector<32x64xbf16>
    %cst_30 = arith.constant dense<0.000000e+00> : vector<64x64xf32>
    %36 = tpu.matmul %33, %35, %cst_30 {dimension_numbers = #tpu.dot_dimension_numbers<[1], [0], [0], [1], [0, 0, 1, 1], [], []>} : vector<64x32xbf16>, vector<32x64xbf16>, vector<64x64xf32> -> vector<64x64xf32>
    %37 = arith.addf %31, %36 : vector<64x64xf32>
    %38 = vector.extract_strided_slice %14 {offsets = [1, 1, 0], sizes = [4, 16, 32], strides = [1, 1, 1]} : vector<6x18x32xbf16> to vector<4x16x32xbf16>
    %39 = vector.shape_cast %38 : vector<4x16x32xbf16> to vector<64x32xbf16>
    %c1_31 = arith.constant 1 : index
    %c1_32 = arith.constant 1 : index
    %c0_33 = arith.constant 0 : index
    %c0_34 = arith.constant 0 : index
    %40 = vector.load %arg5[%c1_31, %c1_32, %c0_33, %c0_34] : memref<3x3x32x64xbf16, #tpu.memory_space<vmem>>, vector<1x1x32x64xbf16>
    %41 = vector.shape_cast %40 : vector<1x1x32x64xbf16> to vector<32x64xbf16>
    %cst_35 = arith.constant dense<0.000000e+00> : vector<64x64xf32>
    %42 = tpu.matmul %39, %41, %cst_35 {dimension_numbers = #tpu.dot_dimension_numbers<[1], [0], [0], [1], [0, 0, 1, 1], [], []>} : vector<64x32xbf16>, vector<32x64xbf16>, vector<64x64xf32> -> vector<64x64xf32>
    %43 = arith.addf %37, %42 : vector<64x64xf32>
    %44 = vector.extract_strided_slice %14 {offsets = [1, 2, 0], sizes = [4, 16, 32], strides = [1, 1, 1]} : vector<6x18x32xbf16> to vector<4x16x32xbf16>
    %45 = vector.shape_cast %44 : vector<4x16x32xbf16> to vector<64x32xbf16>
    %c1_36 = arith.constant 1 : index
    %c2_37 = arith.constant 2 : index
    %c0_38 = arith.constant 0 : index
    %c0_39 = arith.constant 0 : index
    %46 = vector.load %arg5[%c1_36, %c2_37, %c0_38, %c0_39] : memref<3x3x32x64xbf16, #tpu.memory_space<vmem>>, vector<1x1x32x64xbf16>
    %47 = vector.shape_cast %46 : vector<1x1x32x64xbf16> to vector<32x64xbf16>
    %cst_40 = arith.constant dense<0.000000e+00> : vector<64x64xf32>
    %48 = tpu.matmul %45, %47, %cst_40 {dimension_numbers = #tpu.dot_dimension_numbers<[1], [0], [0], [1], [0, 0, 1, 1], [], []>} : vector<64x32xbf16>, vector<32x64xbf16>, vector<64x64xf32> -> vector<64x64xf32>
    %49 = arith.addf %43, %48 : vector<64x64xf32>
    %50 = vector.extract_strided_slice %14 {offsets = [2, 0, 0], sizes = [4, 16, 32], strides = [1, 1, 1]} : vector<6x18x32xbf16> to vector<4x16x32xbf16>
    %51 = vector.shape_cast %50 : vector<4x16x32xbf16> to vector<64x32xbf16>
    %c2_41 = arith.constant 2 : index
    %c0_42 = arith.constant 0 : index
    %c0_43 = arith.constant 0 : index
    %c0_44 = arith.constant 0 : index
    %52 = vector.load %arg5[%c2_41, %c0_42, %c0_43, %c0_44] : memref<3x3x32x64xbf16, #tpu.memory_space<vmem>>, vector<1x1x32x64xbf16>
    %53 = vector.shape_cast %52 : vector<1x1x32x64xbf16> to vector<32x64xbf16>
    %cst_45 = arith.constant dense<0.000000e+00> : vector<64x64xf32>
    %54 = tpu.matmul %51, %53, %cst_45 {dimension_numbers = #tpu.dot_dimension_numbers<[1], [0], [0], [1], [0, 0, 1, 1], [], []>} : vector<64x32xbf16>, vector<32x64xbf16>, vector<64x64xf32> -> vector<64x64xf32>
    %55 = arith.addf %49, %54 : vector<64x64xf32>
    %56 = vector.extract_strided_slice %14 {offsets = [2, 1, 0], sizes = [4, 16, 32], strides = [1, 1, 1]} : vector<6x18x32xbf16> to vector<4x16x32xbf16>
    %57 = vector.shape_cast %56 : vector<4x16x32xbf16> to vector<64x32xbf16>
    %c2_46 = arith.constant 2 : index
    %c1_47 = arith.constant 1 : index
    %c0_48 = arith.constant 0 : index
    %c0_49 = arith.constant 0 : index
    %58 = vector.load %arg5[%c2_46, %c1_47, %c0_48, %c0_49] : memref<3x3x32x64xbf16, #tpu.memory_space<vmem>>, vector<1x1x32x64xbf16>
    %59 = vector.shape_cast %58 : vector<1x1x32x64xbf16> to vector<32x64xbf16>
    %cst_50 = arith.constant dense<0.000000e+00> : vector<64x64xf32>
    %60 = tpu.matmul %57, %59, %cst_50 {dimension_numbers = #tpu.dot_dimension_numbers<[1], [0], [0], [1], [0, 0, 1, 1], [], []>} : vector<64x32xbf16>, vector<32x64xbf16>, vector<64x64xf32> -> vector<64x64xf32>
    %61 = arith.addf %55, %60 : vector<64x64xf32>
    %62 = vector.extract_strided_slice %14 {offsets = [2, 2, 0], sizes = [4, 16, 32], strides = [1, 1, 1]} : vector<6x18x32xbf16> to vector<4x16x32xbf16>
    %63 = vector.shape_cast %62 : vector<4x16x32xbf16> to vector<64x32xbf16>
    %c2_51 = arith.constant 2 : index
    %c2_52 = arith.constant 2 : index
    %c0_53 = arith.constant 0 : index
    %c0_54 = arith.constant 0 : index
    %64 = vector.load %arg5[%c2_51, %c2_52, %c0_53, %c0_54] : memref<3x3x32x64xbf16, #tpu.memory_space<vmem>>, vector<1x1x32x64xbf16>
    %65 = vector.shape_cast %64 : vector<1x1x32x64xbf16> to vector<32x64xbf16>
    %cst_55 = arith.constant dense<0.000000e+00> : vector<64x64xf32>
    %66 = tpu.matmul %63, %65, %cst_55 {dimension_numbers = #tpu.dot_dimension_numbers<[1], [0], [0], [1], [0, 0, 1, 1], [], []>} : vector<64x32xbf16>, vector<32x64xbf16>, vector<64x64xf32> -> vector<64x64xf32>
    %67 = arith.addf %61, %66 : vector<64x64xf32>
    %c0_56 = arith.constant 0 : index
    %c0_57 = arith.constant 0 : index
    %68 = vector.load %arg6[%c0_56, %c0_57] : memref<1x64xf32, #tpu.memory_space<vmem>>, vector<1x64xf32>
    %69 = vector.broadcast %68 : vector<1x64xf32> to vector<64x64xf32>
    %70 = arith.addf %67, %69 : vector<64x64xf32>
    %cst_58 = arith.constant 0.000000e+00 : f32
    %71 = vector.broadcast %cst_58 : f32 to vector<64x64xf32>
    %72 = arith.maximumf %70, %71 : vector<64x64xf32>
    %73 = vector.shape_cast %72 : vector<64x64xf32> to vector<4x16x64xf32>
    %74 = arith.truncf %73 : vector<4x16x64xf32> to vector<4x16x64xbf16>
    %c0_59 = arith.constant 0 : index
    %c0_60 = arith.constant 0 : index
    %c0_61 = arith.constant 0 : index
    %c0_62 = arith.constant 0 : index
    %75 = vector.load %arg7[%c0_59, %c0_60, %c0_61, %c0_62] : memref<1x4x16x64xbf16, #tpu.memory_space<vmem>>, vector<1x4x16x64xbf16>
    %76 = vector.shape_cast %75 : vector<1x4x16x64xbf16> to vector<4x16x64xbf16>
    %77 = vector.shape_cast %74 : vector<4x16x64xbf16> to vector<1x4x16x64xbf16>
    tpu.vector_store %arg7[%c0_59, %c0_60, %c0_61, %c0_62], %77 {strides = array<i32>} : memref<1x4x16x64xbf16, #tpu.memory_space<vmem>>, vector<1x4x16x64xbf16>,
    %78 = vector.shape_cast %73 : vector<4x16x64xf32> to vector<4x8x2x64xf32>
    %cst_63 = arith.constant dense<0xFF800000> : vector<4x8x64xf32>
    %79 = vector.multi_reduction <maximumf>, %78, %cst_63 [2] : vector<4x8x2x64xf32> to vector<4x8x64xf32>
    %80 = vector.shape_cast %79 : vector<4x8x64xf32> to vector<2x2x8x64xf32>
    %cst_64 = arith.constant dense<0xFF800000> : vector<2x8x64xf32>
    %81 = vector.multi_reduction <maximumf>, %80, %cst_64 [1] : vector<2x2x8x64xf32> to vector<2x8x64xf32>
    %82 = arith.truncf %81 : vector<2x8x64xf32> to vector<2x8x64xbf16>
    %c0_65 = arith.constant 0 : index
    %c0_66 = arith.constant 0 : index
    %c0_67 = arith.constant 0 : index
    %c0_68 = arith.constant 0 : index
    %83 = vector.load %arg8[%c0_65, %c0_66, %c0_67, %c0_68] : memref<1x2x8x64xbf16, #tpu.memory_space<vmem>>, vector<1x2x8x64xbf16>
    %84 = vector.shape_cast %83 : vector<1x2x8x64xbf16> to vector<2x8x64xbf16>
    %85 = vector.shape_cast %82 : vector<2x8x64xbf16> to vector<1x2x8x64xbf16>
    tpu.vector_store %arg8[%c0_65, %c0_66, %c0_67, %c0_68], %85 {strides = array<i32>} : memref<1x2x8x64xbf16, #tpu.memory_space<vmem>>, vector<1x2x8x64xbf16>,
    return
  }
  func.func @transform_0(%arg0: i32, %arg1: i32) -> (i32, i32, i32, i32) {
    %c0_i32 = arith.constant 0 : i32
    %c0_i32_0 = arith.constant 0 : i32
    %c0_i32_1 = arith.constant 0 : i32
    return %arg0, %arg1, %c0_i32, %c0_i32_0 : i32, i32, i32, i32
  }
  func.func @transform_1(%arg0: i32, %arg1: i32) -> (i32, i32, i32, i32) {
    %c4_i32 = arith.constant 4 : i32
    %0 = arith.muli %arg1, %c4_i32 : i32
    %c1_i32 = arith.constant 1 : i32
    %1 = arith.subi %0, %c1_i32 : i32
    %c0_i32 = arith.constant 0 : i32
    %2 = arith.maxsi %1, %c0_i32 : i32
    %c0_i32_0 = arith.constant 0 : i32
    %c0_i32_1 = arith.constant 0 : i32
    %c0_i32_2 = arith.constant 0 : i32
    return %arg0, %2, %c0_i32_0, %c0_i32_1 : i32, i32, i32, i32
  }
  func.func @transform_2(%arg0: i32, %arg1: i32) -> (i32, i32, i32, i32) {
    %c4_i32 = arith.constant 4 : i32
    %0 = arith.muli %arg1, %c4_i32 : i32
    %c4_i32_0 = arith.constant 4 : i32
    %1 = arith.addi %0, %c4_i32_0 : i32
    %c15_i32 = arith.constant 15 : i32
    %2 = arith.minsi %1, %c15_i32 : i32
    %c0_i32 = arith.constant 0 : i32
    %c0_i32_1 = arith.constant 0 : i32
    %c0_i32_2 = arith.constant 0 : i32
    return %arg0, %2, %c0_i32, %c0_i32_1 : i32, i32, i32, i32
  }
  func.func @transform_3(%arg0: i32, %arg1: i32) -> (i32, i32, i32, i32) {
    %c0_i32 = arith.constant 0 : i32
    %c0_i32_0 = arith.constant 0 : i32
    %c0_i32_1 = arith.constant 0 : i32
    %c0_i32_2 = arith.constant 0 : i32
    %c0_i32_3 = arith.constant 0 : i32
    return %c0_i32, %c0_i32_0, %c0_i32_1, %c0_i32_2 : i32, i32, i32, i32
  }
  func.func @transform_4(%arg0: i32, %arg1: i32) -> (i32, i32) {
    %c0_i32 = arith.constant 0 : i32
    %c0_i32_0 = arith.constant 0 : i32
    %c0_i32_1 = arith.constant 0 : i32
    return %c0_i32, %c0_i32_0 : i32, i32
  }
  func.func @transform_5(%arg0: i32, %arg1: i32) -> (i32, i32, i32, i32) {
    %c0_i32 = arith.constant 0 : i32
    %c0_i32_0 = arith.constant 0 : i32
    %c0_i32_1 = arith.constant 0 : i32
    return %arg0, %arg1, %c0_i32, %c0_i32_0 : i32, i32, i32, i32
  }
  func.func @transform_6(%arg0: i32, %arg1: i32) -> (i32, i32, i32, i32) {
    %c0_i32 = arith.constant 0 : i32
    %c0_i32_0 = arith.constant 0 : i32
    %c0_i32_1 = arith.constant 0 : i32
    return %arg0, %arg1, %c0_i32, %c0_i32_0 : i32, i32, i32, i32
  }
}

</mosaic_0001>

<bundles_post_ra>
// kernel: tpu_custom_call.1
= control target key start
LH: loop header
LB: loop body
LE: loop exit
PB: predicated region body
PF: predicated region fallthrough
CT: control target
= control target key end

     0   :  { %s3320_s0 = inlined_call_operand.hbm [shape: bf16[2,16,16,32], index: 0, kind: input, shape index: {}]   ;;  %s3321_s1 = inlined_call_operand.hbm [shape: bf16[2,16,16,32], index: 1, kind: input, shape index: {}]   ;;  %s3322_s2 = inlined_call_operand.hbm [shape: bf16[2,16,16,32], index: 2, kind: input, shape index: {}]   ;;  %s3323_s3 = inlined_call_operand.hbm [shape: bf16[3,3,32,64], index: 3, kind: input, shape index: {}]   ;;  %s3324_s4 = inlined_call_operand.vmem [shape: f32[1,64], index: 4, kind: input, shape index: {}]   ;;  %s3325_s5 = inlined_call_operand.hbm [shape: bf16[2,16,16,64], index: 5, kind: output, shape index: {0}]   ;;  %s3326_s6 = inlined_call_operand.hbm [shape: bf16[2,8,8,64], index: 6, kind: output, shape index: {1}]  }
   0x1   :  { %3347 = sst [smem:[#allocation33_spill]] %s3320_s0 }
   0x2   :  { %3348 = sst [smem:[#allocation34_spill]] %s3321_s1 }
   0x3   :  { %3349 = sst [smem:[#allocation35_spill]] %s3322_s2 }
   0x4   :  { %3350 = sst [smem:[#allocation36_spill]] %s3323_s3 }
   0x5   :  { %3351 = sst [smem:[#allocation37_spill]] %s3324_s4 }
   0x6   :  { %3352 = sst [smem:[#allocation38_spill]] %s3325_s5 }
   0x7   :  { %3353 = sst [smem:[#allocation39_spill]] %s3326_s6 }
   0x8   :  { %12 = vsyncpa [#allocation3], 0 }
   0x9   :  { %14 = vsyncpa [#allocation3 + $0x1], 0 }
   0xa   :  { %15 = vsyncpa [#allocation6], 0 }
   0xb   :  { %17 = vsyncpa [#allocation6 + $0x1], 0 }
   0xc   :  { %18 = vsyncpa [#allocation9], 0 }
   0xd   :  { %19 = vsyncpa [#allocation4], 0 }
   0xe   :  { %21 = vsyncpa [#allocation4 + $0x1], 0 }
   0xf   :  { %22 = vsyncpa [#allocation12], 0 }
  0x10   :  { %24 = vsyncpa [#allocation12 + $0x1], 0  ;;  %s2569_s21 = smov 0   ;;  %s2571_s22 = smov 0  }
  0x11   :  { %s2573_s23 = smov 0   ;;  %s2575_s24 = smov 0  }
  0x12   :  { %s2577_s25 = smov 0   ;;  %s2579_s26 = smov 0  }
  0x13   :  { %s2581_s27 = smov 0   ;;  %s2583_s28 = smov 0  }
  0x14   :  { %s2585_s29 = smov 0   ;;  %s2587_s30 = smov 0  }
  0x15   :  { %s2589_s7 = smov 0   ;;  %s2591_s8 = smov 0  }
  0x16   :  { %s2593_s9 = smov 0   ;;  %s2595_s10 = smov 0  }
  0x17 LB: > { %3354 = sst [smem:[#allocation19_spill]] %s2495_s26  ;;  %s39_s11 = sadd.s32 1, %s2519_s8  ;;  %s2527_s10 = sphi %s2595_s10, %s30_s10   ;;  %s2523_s9 = sphi %s2593_s9, %s3408_s9   ;;  %s2519_s8 = sphi %s2591_s8, %s3407_s8   ;;  %s2515_s7 = sphi %s2589_s7, %s3406_s7   ;;  %s2511_s30 = sphi %s2587_s30, %s3405_s30   ;;  %s2507_s29 = sphi %s2585_s29, %s3404_s29   ;;  %s2503_s28 = sphi %s2583_s28, %s3415_s28   ;;  %s2499_s27 = sphi %s2581_s27, %s3414_s27   ;;  %s2495_s26 = sphi %s2579_s26, %s3402_s26   ;;  %s2491_s25 = sphi %s2577_s25, %s3413_s25   ;;  %s2487_s24 = sphi %s2575_s24, %s3412_s24   ;;  %s2483_s23 = sphi %s2573_s23, %s3411_s23   ;;  %s2479_s22 = sphi %s2571_s22, %s3410_s22   ;;  %s2475_s21 = sphi %s2569_s21, %s3409_s21  }
  0x18   : > { %3355 = sst [smem:[#allocation20_spill]] %s2499_s27  ;;  %s42_s12 = sadd.s32 1, %s2523_s9 }
  0x19   : > { %3356 = sst [smem:[#allocation21_spill]] %s2507_s29  ;;  %p40_p0 = scmp.ge.s32.totalorder %s39_s11, 4 }
  0x1a   : > { %3357 = sst [smem:[#allocation22_spill]] %s2511_s30  ;;  %p59_p1 = scmp.eq.s32.totalorder %s2527_s10, 0 }
  0x1b   : > { %3358 = sst [smem:[#allocation23_spill]] %s2515_s7  ;;  %s1863_s13 = sshll.u32 %s2519_s8, 2 }
  0x1c   : > { %3359 = sst [smem:[#allocation24_spill]] %s2519_s8  ;;  %s87_s14 = sadd.s32 1, %s2495_s26 }
  0x1d   : > { %3360 = sst [smem:[#allocation25_spill]] %s2523_s9  ;;  %s3417_s11 = smov (%p40_p0, %s39_s11), 0 }
  0x1e   : > { %3361 = sst [smem:[#allocation26_spill]] %s3417_s11  ;;  %s3419_s12 = smov (!%p40_p0, %s42_s12), %s2523_s9 }
  0x1f   : > { %s47_s15 = ssub.s32 %s2519_s8, %s3417_s11  ;;  %s1864_s16 = sadd.s32 4294967295, %s1863_s13 }
  0x20   : > { %p44_p2 = scmp.ge.s32.totalorder %s3419_s12, 2  ;;  %p76_p3 = scmp.gt.s32.totalorder %s1864_s16, 0 }
  0x21   : > { %s1865_s17 = sshll.u32 %s3417_s11, 2  ;;  %p94_p4 = scmp.ne.s32.totalorder %s2495_s26, %s2491_s25 }
  0x22   : > { %s3421_s12 = smov (%p44_p2, %s3419_s12), 0  ;;  %s3423_s16 = smov (!%p76_p3, %s1864_s16), 0 }
  0x23   : > { %3362 = sst [smem:[#allocation27_spill]] %s3421_s12  ;;  %s2656_s18 = ssub.s32 %s2523_s9, %s3421_s12 }
  0x24   : > { %3363 = sst [smem:[#allocation28_spill]] %s2656_s18  ;;  %s1866_s19 = sadd.s32 4294967295, %s1865_s17 }
  0x25   : > { %s2659_s20 = sor.u32 %s47_s15, %s2656_s18  ;;  %p80_p5 = scmp.gt.s32.totalorder %s1866_s19, 0 }
  0x26   : > { %p49_p6 = scmp.eq.s32.totalorder %s2659_s20, 0  ;;  %p2664_p7 = por %p94_p4, %p59_p1 }
  0x27   : > { %s3425_s19 = smov (!%p80_p5, %s1866_s19), 0  ;;  %p100_p8 = scmp.ne.s32.totalorder %s2491_s25, %s2487_s24 }
  0x28   : > { %s2670_s12 = sadd.s32 4, %s1863_s13  ;;  %s83_s6 = ssub.s32 %s3423_s16, %s3425_s19 }
  0x29   : > { %p112_p9 = scmp.lt.s32.totalorder %s2670_s12, 15  ;;  %s84_s5 = sor.u32 %s83_s6, %s2656_s18 }
  0x2a   : > { %s2674_s15 = sadd.s32 4, %s1865_s17  ;;  %p85_p10 = scmp.eq.s32.totalorder %s84_s5, 0 }
  0x2b   : > { %p3343_p12 = scmp.lt.s32.totalorder %s2527_s10, 8  ;;  %s2682_s4 = sshll.u32 %s2523_s9, 5 }
  0x2c   : > { %s2678_s7 = scalar_select %p85_p10, %s2495_s26, %s87_s14  }
  0x2d   : > { %s300_s30 = sand.u32 1, %s2527_s10   ;;  %s302_s13 = sand.u32 1, %s2495_s26  }
  0x2e   : > { %3365 = sst [smem:[#allocation29_spill]] %s2678_s7  ;;  %s1877_s2 = sshll.u32 %s302_s13, 3 }
  0x2f   : > { %s1880_s19 = sshll.u32 %s3423_s16, 1  ;;  %s304_s0 = scalar_lea.vmem [#allocation5], %s1877_s2 }
  0x30   : > { %s313_s6 = sadd.s32 %s1880_s19, %s2682_s4  ;;  %s318_s5 = sshll.u32 %s304_s0, 4  ;;  %s319_s5 = int_to_ptr.vmem [resolvable:$true] %s318_s5 }
  0x31   : > { %s1882_s17 = sshll.u32 %s313_s6, 2  ;;  %s3366_s1 = sld [smem:[#allocation34_spill]] }
  0x32   : > { %p2082_p13 = pnand %p3343_p12, %p2664_p7  ;;  %s2694_s13 = scalar_lea.sflag [#allocation6], %s300_s30 }
  0x33   : > { %s3335_s16 = smov 64   ;;  %s3337_s19 = smov 4  }
  0x34   : > { %s2701_s0 = sadd.s32 4294967295, %s2527_s10   ;;  %p1869_p0 = scmp.ge.s32.totalorder %s2527_s10, 1 }
  0x35   : > { %p65_p2 = scmp.eq.s32.totalorder %s2701_s0, 0  ;;  %p245_p3 = scmp.lt.s32.totalorder %s2527_s10, 9 }
  0x36   : > { %s3367_s3 = sld [smem:[#allocation36_spill]]  ;;  %s2531_s18 = smov [#allocation8]  }
  0x37   : > { %s315_s7 = scalar_lea.hbm %s3366_s1, %s1882_s17  ;;  %p2714_p4 = por %p100_p8, %p65_p2 }
  0x38   : > { %s316_s9 = sshll.u32 %s315_s7, 4  ;;  %p2718_p5 = pnand %p1869_p0, %p245_p3  ;;  %s317_s9 = int_to_ptr.hbm [resolvable:$true] %s316_s9 }
  0x39   : > { %2084 = dma.hbm_to_vmem [thread:$0]  (!%p2082_p13), %s317_s9, 128, %s319_s5, %s2694_s13, %s3335_s16, %s3335_s16, %s3337_s19  }
  0x3a   : > { %p2074_p7 = pneg %p2718_p5  ;;  %s258_s6 = sshll.u32 %s2531_s18, 4  ;;  %s259_s6 = int_to_ptr.vmem [resolvable:$true] %s258_s6 }
  0x3b   : > { %s1862_s24 = sadd.s32 4294967294, %s2527_s10   ;;  %s51_s17 = sadd.s32 1, %s2507_s29 }
  0x3c   : > { %s256_s7 = sshll.u32 %s3367_s3, 4  ;;  %p2075_p10 = pnand %p2074_p7, %p65_p2  ;;  %s257_s7 = int_to_ptr.hbm [resolvable:$true] %s256_s7 }
  0x3d   : > { %p58_p8 = scmp.ne.s32.totalorder %s2507_s29, %s2503_s28  ;;  %p64_p0 = scmp.ne.s32.totalorder %s2503_s28, %s2499_s27 }
  0x3e   : > { %2077 = dma.hbm_to_vmem [thread:$0]  (!%p2075_p10), %s257_s7, 2304, %s259_s6, [#allocation9], %s3335_s16, %s3335_s16, %s3337_s19  }
  0x3f   : > { %s2736_s5 = scalar_select %p49_p6, %s2507_s29, %s51_s17  }
  0x40   : > { %p2740_p13 = por %p59_p1, %p58_p8  ;;  %p204_p3 = scmp.eq.s32.totalorder %s2701_s0, 7 }
  0x41   : > { %3370 = sst [smem:[#allocation30_spill]] %s2736_s5  ;;  %p210_p7 = scmp.eq.s32.totalorder %s1862_s24, 7 }
  0x42   : > { %p2749_p11 = por %p65_p2, %p64_p0  ;;  %s275_s30 = sand.u32 1, %s2507_s29  }
  0x43   : > { %p2754_p10 = por %p204_p3, %p58_p8  ;;  %p2758_p6 = por %p210_p7, %p64_p0 }
  0x44   : > { %s1872_s18 = sshll.u32 %s275_s30, 5  ;;  %s2030_s6 = sshll.u32 %s2519_s8, 3 }
  0x45   : > { %s3373_s20 = scalar_select %p2754_p10, 1, 0 }
  0x46   : > { %s3375_s7 = scalar_select %p2758_p6, 1, 0 }
  0x47   : > { %3374 = sst [smem:[#allocation31_spill]] %s3373_s20  ;;  %s285_s24 = sadd.s32 %s2030_s6, %s2682_s4 }
  0x48   : > { %3376 = sst [smem:[#allocation32_spill]] %s3375_s7  ;;  %s279_s17 = scalar_lea.vmem [#allocation2], %s1872_s18 }
  0x49   : > { %s290_s16 = sshll.u32 %s279_s17, 4  ;;  %s3377_s19 = sld [smem:[#allocation28_spill]]  ;;  %s291_s16 = int_to_ptr.vmem [resolvable:$true] %s290_s16 }
  0x4a   : > { %s1876_s1 = sshll.u32 %s285_s24, 2  ;;  %s3378_s29 = sld [smem:[#allocation33_spill]] }
  0x4b   : > { %p2079_p8 = pnand %p3343_p12, %p2740_p13  ;;  %s276_s8 = scalar_lea.sflag [#allocation3], %s275_s30 }
  0x4c   : > { %s3379_s6 = smov 4   ;;  %s3380_s18 = smov 64  }
  0x4d   : > { %s123_s24 = sadd.s32 1, %s2483_s23  ;;  %s3427_s12 = smov (!%p112_p9, %s2670_s12), 15 }
  0x4e   : > { %p3381_p0 = scmp.lt.s32.totalorder %s2674_s15, 15  ;;  %p130_p3 = scmp.ne.s32.totalorder %s2483_s23, %s2479_s22 }
  0x4f   : > { %p136_p7 = scmp.ne.s32.totalorder %s2479_s22, %s2475_s21  ;;  %s330_s3 = sand.u32 1, %s2483_s23  }
  0x50   : > { %s287_s26 = scalar_lea.hbm %s3378_s29, %s1876_s1  ;;  %s3429_s15 = smov (!%p3381_p0, %s2674_s15), 15 }
  0x51   : > { %s288_s7 = sshll.u32 %s287_s26, 4  ;;  %s119_s1 = ssub.s32 %s3427_s12, %s3429_s15  ;;  %s289_s7 = int_to_ptr.hbm [resolvable:$true] %s288_s7 }
  0x52   : > { %2081 = dma.hbm_to_vmem [thread:$0]  (!%p2079_p8), %s289_s7, 512, %s291_s16, %s276_s8, %s3380_s18, %s3380_s18, %s3379_s6  }
  0x53   : > { %s120_s29 = sor.u32 %s119_s1, %s3377_s19  ;;  %p2789_p13 = por %p130_p3, %p59_p1 }
  0x54   : > { %p121_p12 = scmp.eq.s32.totalorder %s120_s29, 0  ;;  %p2795_p8 = por %p136_p7, %p65_p2 }
  0x55   : > { %s1883_s16 = sshll.u32 %s330_s3, 3  ;;  %s1885_s5 = sshll.u32 %s3427_s12, 1 }
  0x56   : > { %s2800_s21 = scalar_select %p121_p12, %s2483_s23, %s123_s24  }
  0x57   : > { %s341_s15 = sadd.s32 %s1885_s5, %s2682_s4  ;;  %s332_s19 = scalar_lea.vmem [#allocation7], %s1883_s16 }
  0x58   : > { %s1887_s14 = sshll.u32 %s341_s15, 2  ;;  %s346_s30 = sshll.u32 %s332_s19, 4  ;;  %s347_s30 = int_to_ptr.vmem [resolvable:$true] %s346_s30 }
  0x59   : > { %s3384_s1 = sld [smem:[#allocation35_spill]]  ;;  %p3385_p1 = scmp.lt.s32.totalorder %s2527_s10, 8 }
  0x5a   : > { %s2817_s4 = sand.u32 (!%p2718_p5), 1, %s2503_s28  }
  0x5b   : > { %p2085_p9 = pnand %p3385_p1, %p2789_p13  ;;  %s1889_s12 = sshll.u32 (!%p2718_p5), %s2817_s4, 5 }
  0x5c   : > { %s2823_s24 = scalar_lea.vmem (!%p2718_p5), [#allocation2], %s1889_s12 }
  0x5d   : > { %358 = sbr.rel (%p2718_p5) target bundleno = 463 (0x1cf), region = 40 }
  0x5f   : > { %s343_s27 = scalar_lea.hbm %s3384_s1, %s1887_s14 }
  0x60   : > { %s344_s20 = sshll.u32 %s343_s27, 4  ;;  %s361_s27 = scalar_lea.sflag (!%p2718_p5), [#allocation3], %s2817_s4  ;;  %s345_s20 = int_to_ptr.hbm [resolvable:$true] %s344_s20 }
  0x61   : > { %2087 = dma.hbm_to_vmem [thread:$0]  (!%p2085_p9), %s345_s20, 128, %s347_s30, %s2694_s13, %s3380_s18, %s3380_s18, %s3379_s6  }
  0x62   : > { %2450 = dma.done.wait (%p2749_p11), %s361_s27, 512  }
  0x63   : > { %2452 = vsyncadd (%p2749_p11), %s361_s27, 4294966784  ;;  %s370_s13 = sand.u32 1, %s2701_s0   ;;  %s372_s11 = sand.u32 1, %s2491_s25  }
  0x64   : > { %s2831_s20 = sshll.u32 %s372_s11, 3  ;;  %s371_s6 = scalar_lea.sflag [#allocation6], %s370_s13 }
  0x65   : > { %s374_s18 = scalar_lea.vmem [#allocation5], %s2831_s20 }
  0x66   : > { %2454 = dma.done.wait (%p2714_p4), %s371_s6, 128  }
  0x67   : > { %2456 = vsyncadd (%p2714_p4), %s371_s6, 4294967168  ;;  %s382_s3 = sand.u32 1, %s2479_s22  }
  0x68   : > { %s2839_s2 = sshll.u32 %s382_s3, 3 }
  0x69   : > { %s384_s29 = scalar_lea.vmem [#allocation7], %s2839_s2 }
  0x6a   : > { %2458 = dma.done.wait (%p2795_p8), %s371_s6, 128  }
  0x6b   : > { %2460 = vsyncadd (%p2795_p8), %s371_s6, 4294967168 }
  0x6c   : > { %2462 = dma.done.wait (%p65_p2), [#allocation9], 2304  }
  0x6d   : > { %2464 = vsyncadd (%p65_p2), [#allocation9], 4294964992  ;;  %s3386_s9 = sld [smem:[#allocation22_spill]]  ;;  %v2038_v1 = vld [vmem:[#allocation8 + $0x18] sm:$0xff]  ;;  %v2031_v2 = vld [vmem:[%s2823_s24] sm:$0xff]  ;;  %vm554_vm2 = vcmask 1040384  }
  0x6e   : > { %vm555_vm0 = vsmask.f32 256  ;;  %v2032_v3 = vld [vmem:[%s2823_s24 + $0x8] sm:$0xff]  ;;  %v2033_v4 = vld [vmem:[%s2823_s24 + $0x10] sm:$0xff]  ;;  %2054 = vmatpush.bf16.msra.mxu1 %v2038_v1  ;;  %2055 = vmatpush.bf16.msra.mxu2 %v2038_v1  ;;  %v508_v7 = vshrl.u32 %v2031_v2, 16  ;;  %v511_v8 = vshll.u32 %v2031_v2, 16 }
  0x6f   : > { %v2037_v6 = vld [vmem:[#allocation8 + $0x10] sm:$0xff]  ;;  %v446_v9 = vld [vmem:[%s374_s18] sm:$0xf]  ;;  %2056 = vmatpush.bf16.msra.mxu3 %v2038_v1  ;;  %658 = vmatpush.bf16.msra.mxu0 %v2038_v1  ;;  %v515_v10 = vshrl.u32 %v2032_v3, 16  ;;  %v518_v11 = vshll.u32 %v2032_v3, 16  ;;  %v522_v12 = vshrl.u32 %v2033_v4, 16  ;;  %vm2867_vm3 = vmand %vm554_vm2, %vm555_vm0 }
  0x70   : > { %v525_v13 = vshll.u32 %v2033_v4, 16  ;;  %v447_v14 = vld [vmem:[%s374_s18 + $0x4] sm:$0xf]  ;;  %v510_v15 = vrot.slane %v508_v7, 7  ;;  %v2042_v17 = vld [vmem:[#allocation8 + $0x38] sm:$0xff]  ;;  %v2041_v38 = vld [vmem:[#allocation8 + $0x30] sm:$0xff] }
  0x71   : > { %v2040_v16 = vld [vmem:[#allocation8 + $0x28] sm:$0xff]  ;;  %v517_v21 = vrot.slane %v515_v10, 7  ;;  %v524_v22 = vrot.slane %v522_v12, 7  ;;  %vm573_vm4 = vsmask.f32 7424  ;;  %v2039_v37 = vld [vmem:[#allocation8 + $0x20] sm:$0xff] }
  0x72   : > { %v2036_v25 = vld [vmem:[#allocation8 + $0x8] sm:$0xff]  ;;  %2057 = vmatpush.bf16.msra.mxu1 %v2037_v6  ;;  %2058 = vmatpush.bf16.msra.mxu2 %v2037_v6  ;;  %v513_v27 = vor.u32 %v511_v8, %v510_v15  ;;  %v2873_v28 = vsel %vm2867_vm3, %v510_v15, 0  ;;  %v2035_v42 = vld [vmem:[#allocation8] sm:$0xff]  ;;  %vm639_vm5 = vcmask 261120   ;;  %v2046_v59 = vld [vmem:[#allocation8 + $0x58] sm:$0xff]  ;;  %vm738_vm6 = vcmask 1046528  }
  0x73   : > { %p448_p11 = scmp.gt.s32.totalorder %s3386_s9, 0  ;;  %v2044_v26 = vld [vmem:[#allocation8 + $0x48] sm:$0xff]  ;;  %2059 = vmatpush.bf16.msra.mxu3 %v2037_v6  ;;  %659 = vmatpush.bf16.msra.mxu0 %v2037_v6  ;;  %v594_v29 = vshll.u32 %v2873_v28, 16  ;;  %v520_v30 = vor.u32 %v518_v11, %v517_v21  ;;  %v2878_v31 = vsel %vm2867_vm3, %v517_v21, 0  ;;  %v527_v32 = vor.u32 %v525_v13, %v524_v22  ;;  %v2043_v43 = vld [vmem:[#allocation8 + $0x40] sm:$0xff]  ;;  %v2050_v1 = vld [vmem:[#allocation8 + $0x78] sm:$0xff] }
  0x74   : > { %v2882_v33 = vsel %vm2867_vm3, 0, %v513_v27  ;;  %v606_v34 = vshll.u32 %v2878_v31, 16  ;;  %v2887_v35 = vsel %vm2867_vm3, %v524_v22, 0  ;;  %v2048_v62 = vld [vmem:[#allocation8 + $0x68] sm:$0xff]  ;;  %v743_v22 = vrot.slane %v2873_v28, 1  ;;  %p456_p12 = scmp.lt.s32.totalorder %s3386_s9, 3 }
  0x75   : > { %s449_s26 = scalar_select %p448_p11, 1, 0  ;;  %v587_v39 = vshrl.u32 %v2882_v33, 16  ;;  %v589_v40 = vshll.u32 %v2882_v33, 16  ;;  %v2893_v41 = vsel %vm2867_vm3, 0, %v520_v30  ;;  %v596_v44 = vrot.slane %v594_v29, 1 }
  0x76   : > { %786 = vmatpush.bf16.msrb.mxu2 %v2040_v16  ;;  %707 = vmatpush.bf16.msrb.mxu1 %v2036_v25  ;;  %v599_v45 = vshrl.u32 %v2893_v41, 16  ;;  %v601_v46 = vshll.u32 %v2893_v41, 16  ;;  %v2899_v47 = vsel %vm2867_vm3, 0, %v527_v32  ;;  %v618_v51 = vshll.u32 %v2887_v35, 16  ;;  %v2052_v13 = vld [vmem:[#allocation8 + $0x88] sm:$0xff]  ;;  %s3391_s5 = sld [smem:[#allocation37_spill]] }
  0x77   : > { %v450_v0 = vstv %s449_s26  ;;  %843 = vmatpush.bf16.msrb.mxu3 %v2042_v17  ;;  %911 = vmatpush.bf16.msrb.mxu0 %v2044_v26  ;;  %v591_v48 = vrot.slane %v589_v40, 1  ;;  %v611_v49 = vshrl.u32 %v2899_v47, 16  ;;  %v613_v50 = vshll.u32 %v2899_v47, 16  ;;  %v2034_v26 = vld [vmem:[%s2823_s24 + $0x18] sm:$0xff]  ;;  %s457_s0 = scalar_select %p456_p12, 1, 0 }
  0x78   : > { %vm2854_vm1 = vcmp.eq.s32.totalorder %v450_v0, 1  ;;  %v603_v52 = vrot.slane %v601_v46, 1  ;;  %v608_v53 = vrot.slane %v606_v34, 1  ;;  %v620_v58 = vrot.slane %v618_v51, 1  ;;  %s3031_s15 = scalar_lea.vmem [#allocation10], %s1889_s12  ;;  %s3392_s14 = sld [smem:[#allocation23_spill]] }
  0x79   : > { %v452_v18 = vsel %vm2854_vm1, %v446_v9, 0  ;;  %v453_v19 = vsel %vm2854_vm1, %v447_v14, 0  ;;  %v592_v56 = vor.u32 %v591_v48, %v587_v39  ;;  %v615_v57 = vrot.slane %v613_v50, 1  ;;  %v455_v50 = vld [vmem:[%s384_s29 + $0x4] sm:$0xf]  ;;  %s2053_s19 = sshll.u32 %s3386_s9, 3 }
  0x7a   : > { %v482_v23 = vunpack.c.l.b16 %v452_v18  ;;  %v483_v24 = vunpack.c.l.b16 %v453_v19  ;;  %787 = vmatpush.bf16.msrb.mxu2 %v2039_v37  ;;  %708 = vmatpush.bf16.msrb.mxu1 %v2035_v42  ;;  %v604_v60 = vor.u32 %v603_v52, %v599_v45  ;;  %v2047_v18 = vld [vmem:[#allocation8 + $0x60] sm:$0xff]  ;;  %v2049_v19 = vld [vmem:[#allocation8 + $0x70] sm:$0xff]  ;;  %v742_v21 = vrot.slane %v2882_v33, 1  ;;  %s3393_s27 = sld [smem:[#allocation38_spill]]  ;;  %s1654_s11 = sshll.u32 %s3031_s15, 4  ;;  %s3191_s11 = int_to_ptr.vmem [resolvable:$true] %s1654_s11 }
  0x7b   : > { %844 = vmatpush.bf16.msrb.mxu3 %v2041_v38  ;;  %912 = vmatpush.bf16.msrb.mxu0 %v2043_v43  ;;  %v597_v63 = vsel %vm573_vm4, %v592_v56, %v596_v44  ;;  %v616_v0 = vor.u32 %v615_v57, %v611_v49  ;;  %v745_v27 = vrot.slane %v2893_v41, 1  ;;  %v746_v28 = vrot.slane %v2878_v31, 1  ;;  %v454_v49 = vld [vmem:[%s384_s29] sm:$0xf]  ;;  %s1634_s18 = scalar_lea.sflag [#allocation4], %s2817_s4 }
  0x7c   : > { %v494_v36 = vpack.c.b16 %v483_v24, %v482_v23  ;;  %1920 = vmatmul.msk.bf16.vlgmr.msra.gmra.mxu1 %vm639_vm5, %v597_v63  ;;  %v2907_v2 = vsel %vm573_vm4, %v604_v60, %v608_v53  ;;  %v2045_v23 = vld [vmem:[#allocation8 + $0x50] sm:$0xff]  ;;  %v2051_v24 = vld [vmem:[#allocation8 + $0x80] sm:$0xff]  ;;  %v744_v25 = vsel %vm738_vm6, %v742_v21, %v743_v22  ;;  %v529_v29 = vshrl.u32 %v2034_v26, 16 }
  0x7d   : > { %1921 = vmatmul.msk.bf16.vlgmr.msra.gmra.mxu2 %vm639_vm5, %v2907_v2  ;;  %v2914_v5 = vsel %vm573_vm4, %v616_v0, %v620_v58  ;;  %v747_v30 = vsel %vm738_vm6, %v745_v27, %v746_v28  ;;  %v748_v31 = vrot.slane %v2899_v47, 1  ;;  %v749_v37 = vrot.slane %v2887_v35, 1 }
  0x7e   : > { %v501_v54 = vshrl.u32 %v494_v36, 16  ;;  %v504_v55 = vshll.u32 %v494_v36, 16  ;;  %973 = vmatpush.bf16.msra.mxu1 %v2046_v59  ;;  %1922 = vmatmul.msk.bf16.vlgmr.msra.gmra.mxu3 %vm639_vm5, %v2914_v5  ;;  %v531_v32 = vrot.slane %v529_v29, 7  ;;  %v458_v48 = vstv %s457_s0  ;;  %s2023_s30 = sshll.u32 %s3392_s14, 5 }
  0x7f   : > { %1030 = vmatpush.bf16.msra.mxu2 %v2048_v62  ;;  %1098 = vmatpush.bf16.msra.mxu3 %v2050_v1  ;;  %v750_v40 = vsel %vm738_vm6, %v748_v31, %v749_v37  ;;  %vm459_vm7 = vcmp.eq.s32.totalorder %v458_v48, 1  ;;  %vm1284_vm8 = vcmask 517120   ;;  %vm1219_vm9 = vcmask 519168   ;;  %s1651_s7 = sadd.s32 %s2053_s19, %s2023_s30 }
  0x80   : > { %v503_v61 = vrot.slane %v501_v54, 7  ;;  %v567_v39 = vsel %vm2867_vm3, %v531_v32, 0  ;;  %v460_v51 = vsel %vm459_vm7, %v454_v49, 0  ;;  %v461_v52 = vsel %vm459_vm7, %v455_v50, 0  ;;  %s2024_s17 = sshll.u32 %s1651_s7, 2  ;;  %s3394_s13 = smov %s3393_s27 }
  0x81   : > { %v881_v44 = vshll.u32 %v567_v39, 16  ;;  %v492_v53 = vunpack.c.l.b16 %v460_v51  ;;  %v493_v54 = vunpack.c.l.b16 %v461_v52  ;;  %vm1509_vm10 = vcmask 523264   ;;  %s3165_s24 = scalar_lea.hbm %s3393_s27, %s2024_s17  ;;  %s2357_s0 = scalar_lea.hbm %s3394_s13, 256 }
  0x82   : > { %v506_v3 = vor.u32 %v504_v55, %v503_v61  ;;  %v563_v4 = vsel %vm2867_vm3, %v503_v61, 0  ;;  %974 = vmatpush.bf16.msra.mxu1 %v2045_v23  ;;  %vm1606_vm11 = vcmask 1041409   ;;  %vm1608_vm12 = vcmask 1042434   ;;  %s1656_s20 = sshll.u32 %s3165_s24, 4  ;;  %s3193_s20 = int_to_ptr.hbm [resolvable:$true] %s1656_s20 }
  0x83   : > { %v582_v6 = vshll.u32 %v563_v4, 16  ;;  %v740_v16 = vrot.slane %v563_v4, 1  ;;  %1031 = vmatpush.bf16.msra.mxu2 %v2047_v18  ;;  %1099 = vmatpush.bf16.msra.mxu3 %v2049_v19  ;;  %v883_v35 = vrot.slane %v881_v44, 1  ;;  %v499_v55 = vpack.c.b16 %v493_v54, %v492_v53  ;;  %s2351_s3 = sshra.s32 %s3193_s20, 4  ;;  %s2352_s3 = int_to_ptr.hbm [resolvable:$true] %s2351_s3 }
  0x84   : > { %v557_v7 = vsel %vm2867_vm3, 0, %v506_v3  ;;  %vm1610_vm13 = vcmask 1043459   ;;  %vm1612_vm14 = vcmask 1044484   ;;  %vm1614_vm15 = vcmask 1045509   ;;  %s2353_s2 = scalar_lea.hbm %s2352_s3, 32  ;;  %p2358_p0 = scmp.lt.s32.totalorder %s2352_s3, %s3394_s13 }
  0x85   : > { %v575_v8 = vshrl.u32 %v557_v7, 16  ;;  %v577_v9 = vshll.u32 %v557_v7, 16  ;;  %v584_v11 = vrot.slane %v582_v6, 1  ;;  %v739_v15 = vrot.slane %v557_v7, 1  ;;  %p2354_p2 = scmp.ne.s32.totalorder %s2352_s3, %s2353_s2  ;;  %p2359_p3 = scmp.lt.s32.totalorder %s2357_s0, %s2353_s2 }
  0x86   : > { %v539_v57 = vshll.u32 %v499_v55, 16 }
  0x87   : > { %v579_v10 = vrot.slane %v577_v9, 1  ;;  %v741_v17 = vsel %vm738_vm6, %v739_v15, %v740_v16  ;;  %p2355_p4 = pnand %p2354_p2, %p2754_p10  ;;  %p2360_p7 = por %p2359_p3, %p2358_p0 }
  0x89   : > { %v580_v12 = vor.u32 %v579_v10, %v575_v8  ;;  %p2356_p5 = pneg %p2355_p4 }
  0x8b   : > { %v585_v14 = vsel %vm573_vm4, %v580_v12, %v584_v11  ;;  %p2361_p13 = pnand %p2360_p7, %p2356_p5 }
  0x8c   : > { %1919 = vmatmul.msk.bf16.vlgmr.msra.gmra.mxu0 %vm639_vm5, %v585_v14  ;;  %1931 = vmatmul.msk.bf16.vlgmr.msrb.gmra.mxu1 %vm639_vm5, %v557_v7 }
  0x8d   : > { %1160 = vmatpush.bf16.msra.mxu0 %v2052_v13  ;;  %1943 = vmatmul.msk.bf16.vlgmr.msrb.gmra.mxu2 %vm639_vm5, %v741_v17 }
  0x8e   : > { %1955 = vmatmul.msk.bf16.vlgmr.msrb.gmra.mxu3 %vm639_vm5, %v2882_v33 }
  0x91   : > { %1161 = vmatpush.bf16.msra.mxu0 %v2051_v24 }
  0x9c   : > { %1967 = vmatmul.msk.bf16.vlgmr.msrb.gmra.mxu0 %vm639_vm5, %v597_v63  ;;  %1932 = vmatmul.msk.bf16.gmra.mxu1 %vm639_vm5, %v2882_v33  ;;  %v532_v33 = vshll.u32 %v2034_v26, 16 }
  0x9d   : > { %1944 = vmatmul.msk.bf16.gmra.mxu2 %vm639_vm5, %v744_v25 }
  0x9e   : > { %1956 = vmatmul.msk.bf16.gmra.mxu3 %vm639_vm5, %v2893_v41  ;;  %v534_v34 = vor.u32 %v532_v33, %v531_v32 }
  0xa0   : > { %v561_v36 = vsel %vm2867_vm3, 0, %v534_v34 }
  0xa1   : > { %v876_v38 = vshll.u32 %v561_v36, 16  ;;  %v874_v42 = vshrl.u32 %v561_v36, 16  ;;  %v944_v60 = vrot.slane %v561_v36, 1 }
  0xa3   : > { %v878_v43 = vrot.slane %v876_v38, 1 }
  0xa5   : > { %v879_v45 = vor.u32 %v878_v43, %v874_v42 }
  0xa7   : > { %v884_v46 = vsel %vm573_vm4, %v879_v45, %v883_v35 }
  0xac   : > { %1968 = vmatmul.msk.bf16.gmra.mxu0 %vm639_vm5, %v2907_v2  ;;  %1933 = vmatmul.msk.bf16.gmra.mxu1 %vm639_vm5, %v2893_v41 }
  0xad   : > { %1945 = vmatmul.msk.bf16.gmra.mxu2 %vm639_vm5, %v747_v30 }
  0xae   : > { %1957 = vmatmul.msk.bf16.gmra.mxu3 %vm639_vm5, %v2899_v47 }
  0xbc   : > { %1969 = vmatmul.msk.bf16.gmra.mxu0 %vm639_vm5, %v2914_v5  ;;  %1934 = vmatmul.msk.bf16.gmra.mxu1 %vm639_vm5, %v2899_v47 }
  0xbd   : > { %1946 = vmatmul.msk.bf16.gmra.mxu2 %vm639_vm5, %v750_v40 }
  0xbe   : > { %1958 = vmatmul.msk.bf16.gmra.mxu3 %vm639_vm5, %v561_v36 }
  0xcc   : > { %1970 = vmatmul.msk.bf16.gmra.mxu0 %vm639_vm5, %v884_v46  ;;  %1979 = vmatmul.msk.bf16.vlgmr.msra.gmra.mxu1 %vm639_vm5, %v744_v25 }
  0xcd   : > { %1991 = vmatmul.msk.bf16.vlgmr.msra.gmra.mxu2 %vm639_vm5, %v2893_v41  ;;  %v536_v41 = vshrl.u32 %v499_v55, 16 }
  0xce   : > { %2003 = vmatmul.msk.bf16.vlgmr.msra.gmra.mxu3 %vm639_vm5, %v2907_v2 }
  0xcf   : > { %v538_v56 = vrot.slane %v536_v41, 7 }
  0xd1   : > { %v541_v58 = vor.u32 %v539_v57, %v538_v56  ;;  %v568_v62 = vsel %vm2867_vm3, %v538_v56, 0 }
  0xd2   : > { %v1068_v2 = vshll.u32 %v568_v62, 16  ;;  %v1132_v7 = vrot.slane %v568_v62, 1 }
  0xd3   : > { %v562_v59 = vsel %vm2867_vm3, 0, %v541_v58 }
  0xd4   : > { %v1063_v61 = vshll.u32 %v562_v59, 16  ;;  %v1061_v0 = vshrl.u32 %v562_v59, 16  ;;  %v1070_v4 = vrot.slane %v1068_v2, 1  ;;  %v1131_v20 = vrot.slane %v562_v59, 1 }
  0xd6   : > { %v1065_v1 = vrot.slane %v1063_v61, 1  ;;  %v1133_v12 = vsel %vm738_vm6, %v1131_v20, %v1132_v7 }
  0xd8   : > { %v1066_v3 = vor.u32 %v1065_v1, %v1061_v0 }
  0xda   : > { %v1071_v6 = vsel %vm573_vm4, %v1066_v3, %v1070_v4 }
  0xdc   : > { %2015 = vmatmul.msk.bf16.vlgmr.msra.gmra.mxu0 %vm639_vm5, %v747_v30  ;;  %1980 = vmatmul.msk.bf16.gmra.mxu1 %vm639_vm5, %v747_v30 }
  0xdd   : > { %1992 = vmatmul.msk.bf16.gmra.mxu2 %vm639_vm5, %v2899_v47  ;;  %v945_v47 = vrot.slane %v567_v39, 1 }
  0xde   : > { %2004 = vmatmul.msk.bf16.gmra.mxu3 %vm639_vm5, %v2914_v5 }
  0xdf   : > { %v946_v63 = vsel %vm738_vm6, %v944_v60, %v945_v47 }
  0xec   : > { %2016 = vmatmul.msk.bf16.gmra.mxu0 %vm639_vm5, %v750_v40  ;;  %1981 = vmatmul.msk.bf16.gmra.mxu1 %vm639_vm5, %v750_v40 }
  0xed   : > { %1993 = vmatmul.msk.bf16.gmra.mxu2 %vm639_vm5, %v561_v36 }
  0xee   : > { %2005 = vmatmul.msk.bf16.gmra.mxu3 %vm639_vm5, %v884_v46 }
  0xf9   : > { %v2988_v5 = vpop.f32.mrf.mxu1 }
  0xfc   : > { %2017 = vmatmul.msk.bf16.gmra.mxu0 %vm639_vm5, %v946_v63  ;;  %1982 = vmatmul.msk.bf16.gmra.mxu1 %vm639_vm5, %v946_v63 }
  0xfd   : > { %1994 = vmatmul.msk.bf16.gmra.mxu2 %vm639_vm5, %v562_v59 }
  0xfe   : > { %2006 = vmatmul.msk.bf16.gmra.mxu3 %vm639_vm5, %v1071_v6 }
 0x100   : > { %v671_v8 = vpop.f32.mrf.mxu2 }
 0x101   : > { %v676_v9 = vpop.f32.mrf.mxu3  ;;  %v2994_v10 = vpop.f32.mrf.mxu1 }
 0x108   : > { %v673_v13 = vpop.f32.mrf.mxu2 }
 0x109   : > { %v661_v11 = vpop.f32.mrf.mxu0  ;;  %v678_v14 = vpop.f32.mrf.mxu3 }
 0x10a   : > { %v710_v15 = vpop.f32.mrf.mxu1 }
 0x10b   : > { %v711_v57 = vadd.f32 %v710_v15, %v661_v11 }
 0x10c   : > { %2018 = vmatmul.msk.bf16.gmra.mxu0 %vm639_vm5, %v1133_v12 }
 0x110   : > { %v789_v17 = vpop.f32.mrf.mxu2 }
 0x111   : > { %v663_v16 = vpop.f32.mrf.mxu0  ;;  %v846_v18 = vpop.f32.mrf.mxu3  ;;  %v809_v60 = vadd.f32 %v789_v17, %v711_v57 }
 0x112   : > { %v712_v19 = vpop.f32.mrf.mxu1 }
 0x113   : > { %v866_v62 = vadd.f32 %v846_v18, %v809_v60  ;;  %v713_v2 = vadd.f32 %v712_v19, %v663_v16  ;;  %v3021_v18 = vld [vmem:[%s3391_s5] ss:$0 sm:$0xff] }
 0x118   : > { %v791_v22 = vpop.f32.mrf.mxu2 }
 0x119   : > { %v914_v21 = vpop.f32.mrf.mxu0  ;;  %v848_v23 = vpop.f32.mrf.mxu3  ;;  %v810_v6 = vadd.f32 %v791_v22, %v713_v2 }
 0x11a   : > { %v715_v24 = vpop.f32.mrf.mxu1  ;;  %v934_v20 = vadd.f32 %v914_v21, %v866_v62 }
 0x11b   : > { %v867_v11 = vadd.f32 %v848_v23, %v810_v6  ;;  %v716_v16 = vadd.f32 %v715_v24, %v2988_v5 }
 0x120   : > { %v794_v26 = vpop.f32.mrf.mxu2 }
 0x121   : > { %v916_v25 = vpop.f32.mrf.mxu0  ;;  %v2998_v27 = vpop.f32.mrf.mxu3  ;;  %v811_v21 = vadd.f32 %v794_v26, %v716_v16 }
 0x122   : > { %v3000_v28 = vpop.f32.mrf.mxu1  ;;  %v935_v22 = vadd.f32 %v916_v25, %v867_v11 }
 0x123   : > { %v718_v25 = vadd.f32 %v3000_v28, %v2994_v10 }
 0x128   : > { %v3004_v30 = vpop.f32.mrf.mxu2 }
 0x129   : > { %v3002_v29 = vpop.f32.mrf.mxu0  ;;  %v3006_v32 = vpop.f32.mrf.mxu3  ;;  %v812_v28 = vadd.f32 %v3004_v30, %v718_v25 }
 0x12a   : > { %v720_v33 = vpop.f32.mrf.mxu1 }
 0x12b   : > { %v721_v34 = vadd.f32 %v720_v33, %v671_v8  ;;  %v869_v30 = vadd.f32 %v3006_v32, %v812_v28 }
 0x130   : > { %v799_v31 = vpop.f32.mrf.mxu2 }
 0x131   : > { %v3008_v36 = vpop.f32.mrf.mxu0  ;;  %v813_v37 = vadd.f32 %v799_v31, %v721_v34  ;;  %v856_v38 = vpop.f32.mrf.mxu3 }
 0x132   : > { %v722_v39 = vpop.f32.mrf.mxu1 }
 0x133   : > { %v723_v40 = vadd.f32 %v722_v39, %v673_v13  ;;  %v870_v43 = vadd.f32 %v856_v38, %v813_v37 }
 0x138   : > { %v801_v45 = vpop.f32.mrf.mxu2 }
 0x139   : > { %v924_v42 = vpop.f32.mrf.mxu0  ;;  %v814_v35 = vadd.f32 %v801_v45, %v723_v40  ;;  %v858_v46 = vpop.f32.mrf.mxu3  ;;  %v868_v40 = vadd.f32 %v2998_v27, %v811_v21 }
 0x13a   : > { %v3010_v44 = vadd.f32 %v924_v42, %v870_v43  ;;  %v725_v48 = vpop.f32.mrf.mxu1 }
 0x13b   : > { %v726_v49 = vadd.f32 %v725_v48, %v676_v9  ;;  %v871_v51 = vadd.f32 %v858_v46, %v814_v35 }
 0x140   : > { %v804_v53 = vpop.f32.mrf.mxu2 }
 0x141   : > { %v926_v50 = vpop.f32.mrf.mxu0  ;;  %v815_v54 = vadd.f32 %v804_v53, %v726_v49  ;;  %v861_v55 = vpop.f32.mrf.mxu3 }
 0x142   : > { %v3012_v52 = vadd.f32 %v926_v50, %v871_v51  ;;  %v727_v41 = vpop.f32.mrf.mxu1 }
 0x143   : > { %v728_v56 = vadd.f32 %v727_v41, %v678_v14  ;;  %v872_v59 = vadd.f32 %v861_v55, %v815_v54  ;;  %v936_v55 = vadd.f32 %v3002_v29, %v868_v40 }
 0x148   : > { %v806_v61 = vpop.f32.mrf.mxu2 }
 0x149   : > { %v929_v58 = vpop.f32.mrf.mxu0  ;;  %v816_v63 = vadd.f32 %v806_v61, %v728_v56  ;;  %v863_v0 = vpop.f32.mrf.mxu3 }
 0x14a   : > { %v3014_v47 = vadd.f32 %v929_v58, %v872_v59  ;;  %v976_v1 = vpop.f32.mrf.mxu1 }
 0x14b   : > { %v873_v4 = vadd.f32 %v863_v0, %v816_v63  ;;  %v996_v8 = vadd.f32 %v976_v1, %v934_v20 }
 0x150   : > { %v1033_v9 = vpop.f32.mrf.mxu2 }
 0x151   : > { %v931_v3 = vpop.f32.mrf.mxu0  ;;  %v1053_v12 = vadd.f32 %v1033_v9, %v996_v8  ;;  %v1101_v13 = vpop.f32.mrf.mxu3 }
 0x152   : > { %v3016_v7 = vadd.f32 %v931_v3, %v873_v4  ;;  %v978_v14 = vpop.f32.mrf.mxu1 }
 0x153   : > { %v1121_v17 = vadd.f32 %v1101_v13, %v1053_v12  ;;  %v997_v34 = vadd.f32 %v978_v14, %v935_v22 }
 0x158   : > { %v1035_v31 = vpop.f32.mrf.mxu2 }
 0x159   : > { %v1163_v15 = vpop.f32.mrf.mxu0  ;;  %v1054_v37 = vadd.f32 %v1035_v31, %v997_v34  ;;  %v1103_v38 = vpop.f32.mrf.mxu3 }
 0x15a   : > { %v1183_v19 = vadd.f32 %v1163_v15, %v1121_v17  ;;  %v981_v39 = vpop.f32.mrf.mxu1 }
 0x15b   : > { %v1122_v35 = vadd.f32 %v1103_v38, %v1054_v37  ;;  %v998_v61 = vadd.f32 %v981_v39, %v936_v55 }
 0x15c   : > { %v1195_v33 = vadd.f32 %v3021_v18, %v1183_v19 }
 0x15e   : > { %v1203_v23 = vmax.f32 %v1195_v33, 0.0 }
 0x160   : > { %v1211_v42 = vpack.c.bf16 %v1203_v23, %v1203_v23  ;;  %v1236_v43 = vrot.slane %v1203_v23, 2  ;;  %v1237_v45 = vrot.slane %v1203_v23, 4  ;;  %v1238_v5 = vrot.slane %v1203_v23, 6  ;;  %v1038_v59 = vpop.f32.mrf.mxu2 }
 0x161   : > { %v1165_v24 = vpop.f32.mrf.mxu0  ;;  %v1285_v26 = vsel %vm1284_vm8, %v1203_v23, -inf  ;;  %v1106_v2 = vpop.f32.mrf.mxu3  ;;  %v1055_v6 = vadd.f32 %v1038_v59, %v998_v61  ;;  %v937_v23 = vadd.f32 %v3008_v36, %v869_v30 }
 0x162   : > { %1220 = vst.msk [vmem:[%s3031_s15] sm:$0xf] %vm1219_vm9, %v1211_v42  ;;  %v1286_v46 = vrot.slane %v1285_v26, 4  ;;  %v1292_v27 = vsel %vm1284_vm8, %v1236_v43, -inf  ;;  %v1299_v48 = vsel %vm1284_vm8, %v1237_v45, -inf  ;;  %v1306_v49 = vsel %vm1284_vm8, %v1238_v5, -inf  ;;  %v983_v3 = vpop.f32.mrf.mxu1 }
 0x163   : > { %v1293_v50 = vrot.slane %v1292_v27, 4  ;;  %v1300_v51 = vrot.slane %v1299_v48, 4  ;;  %v1307_v53 = vrot.slane %v1306_v49, 4  ;;  %v1184_v10 = vadd.f32 %v1165_v24, %v1122_v35 }
 0x164   : > { %v1287_v54 = vmax.f32 %v1285_v26, %v1286_v46  ;;  %v1123_v21 = vadd.f32 %v1106_v2, %v1055_v6  ;;  %v999_v5 = vadd.f32 %v983_v3, %v937_v23 }
 0x165   : > { %v1294_v41 = vmax.f32 %v1292_v27, %v1293_v50  ;;  %v1301_v56 = vmax.f32 %v1299_v48, %v1300_v51  ;;  %v1308_v57 = vmax.f32 %v1306_v49, %v1307_v53  ;;  %v1196_v58 = vadd.f32 %v3021_v18, %v1184_v10 }
 0x166   : > { %v1288_v60 = vrot.slane %v1287_v54, 2 }
 0x167   : > { %v1295_v62 = vrot.slane %v1294_v41, 2  ;;  %v1302_v63 = vrot.slane %v1301_v56, 2  ;;  %v1309_v0 = vrot.slane %v1308_v57, 2  ;;  %v1204_v1 = vmax.f32 %v1196_v58, 0.0 }
 0x168   : > { %v1289_v4 = vmax.f32 %v1287_v54, %v1288_v60  ;;  %v1040_v37 = vpop.f32.mrf.mxu2 }
 0x169   : > { %v1296_v29 = vmax.f32 %v1294_v41, %v1295_v62  ;;  %v1303_v20 = vmax.f32 %v1301_v56, %v1302_v63  ;;  %v1310_v8 = vmax.f32 %v1308_v57, %v1309_v0  ;;  %v1212_v9 = vpack.c.bf16 %v1204_v1, %v1204_v1  ;;  %v1168_v14 = vpop.f32.mrf.mxu0  ;;  %v1108_v50 = vpop.f32.mrf.mxu3 }
 0x16a   : > { %v1239_v11 = vrot.slane %v1204_v1, 2  ;;  %v1240_v12 = vrot.slane %v1204_v1, 4  ;;  %v1241_v13 = vrot.slane %v1204_v1, 6  ;;  %v1290_v15 = vrot.slane %v1289_v4, 1  ;;  %v986_v36 = vpop.f32.mrf.mxu1 }
 0x16b   : > { %v1297_v17 = vrot.slane %v1296_v29, 1  ;;  %1221 = vst.msk [vmem:[%s3031_s15 + $0x4] sm:$0xf] %vm1219_vm9, %v1212_v9  ;;  %v1313_v16 = vsel %vm1284_vm8, %v1204_v1, -inf  ;;  %v1304_v33 = vrot.slane %v1303_v20, 1  ;;  %v1311_v34 = vrot.slane %v1310_v8, 1 }
 0x16c   : > { %v1314_v19 = vrot.slane %v1313_v16, 4  ;;  %v1320_v22 = vsel %vm1284_vm8, %v1239_v11, -inf  ;;  %v1327_v32 = vsel %vm1284_vm8, %v1240_v12, -inf  ;;  %v1334_v40 = vsel %vm1284_vm8, %v1241_v13, -inf }
 0x16d   : > { %v1321_v31 = vrot.slane %v1320_v22, 4  ;;  %v1328_v39 = vrot.slane %v1327_v32, 4  ;;  %v1291_v42 = vmax.f32 %v1289_v4, %v1290_v15  ;;  %v1298_v43 = vmax.f32 %v1296_v29, %v1297_v17 }
 0x16e   : > { %v1315_v38 = vmax.f32 %v1313_v16, %v1314_v19  ;;  %v1335_v26 = vrot.slane %v1334_v40, 4  ;;  %v1185_v35 = vadd.f32 %v1168_v14, %v1123_v21  ;;  %v1305_v46 = vmax.f32 %v1303_v20, %v1304_v33 }
 0x16f   : > { %v1322_v45 = vmax.f32 %v1320_v22, %v1321_v31  ;;  %v1329_v25 = vmax.f32 %v1327_v32, %v1328_v39  ;;  %v1312_v27 = vmax.f32 %v1310_v8, %v1311_v34  ;;  %v1056_v49 = vadd.f32 %v1040_v37, %v999_v5 }
 0x170   : > { %v1316_v24 = vrot.slane %v1315_v38, 2  ;;  %v1336_v10 = vmax.f32 %v1334_v40, %v1335_v26  ;;  %v1197_v28 = vadd.f32 %v3021_v18, %v1185_v35  ;;  %v3051_v54 = vsel %vm1509_vm10, %v1291_v42, -inf  ;;  %v1043_v9 = vpop.f32.mrf.mxu2 }
 0x171   : > { %v1323_v48 = vrot.slane %v1322_v45, 2  ;;  %v1330_v53 = vrot.slane %v1329_v25, 2  ;;  %v3054_v55 = vsel %vm1509_vm10, %v1298_v43, -inf  ;;  %v1124_v56 = vadd.f32 %v1108_v50, %v1056_v49  ;;  %v1170_v61 = vpop.f32.mrf.mxu0  ;;  %v1111_v37 = vpop.f32.mrf.mxu3 }
 0x172   : > { %v1317_v51 = vmax.f32 %v1315_v38, %v1316_v24  ;;  %v1337_v59 = vrot.slane %v1336_v10, 2  ;;  %v1205_v60 = vmax.f32 %v1197_v28, 0.0  ;;  %v3057_v62 = vsel %vm1509_vm10, %v1305_v46, -inf  ;;  %v988_v38 = vpop.f32.mrf.mxu1 }
 0x173   : > { %v1324_v41 = vmax.f32 %v1322_v45, %v1323_v48  ;;  %v1331_v58 = vmax.f32 %v1329_v25, %v1330_v53  ;;  %v3060_v63 = vsel %vm1509_vm10, %v1312_v27, -inf  ;;  %v1186_v1 = vadd.f32 %v1170_v61, %v1124_v56 }
 0x174   : > { %v1318_v57 = vrot.slane %v1317_v51, 1  ;;  %v1338_v30 = vmax.f32 %v1336_v10, %v1337_v59  ;;  %v1213_v4 = vpack.c.bf16 %v1205_v60, %v1205_v60  ;;  %v1242_v29 = vrot.slane %v1205_v60, 2 }
 0x175   : > { %v1325_v0 = vrot.slane %v1324_v41, 1  ;;  %v1332_v3 = vrot.slane %v1331_v58, 1  ;;  %v1243_v20 = vrot.slane %v1205_v60, 4  ;;  %v1244_v8 = vrot.slane %v1205_v60, 6 }
 0x176   : > { %v1319_v2 = vmax.f32 %v1317_v51, %v1318_v57  ;;  %v1339_v12 = vrot.slane %v1338_v30, 1  ;;  %1222 = vst.msk [vmem:[%s3031_s15 + $0x8] sm:$0xf] %vm1219_vm9, %v1213_v4  ;;  %v1341_v13 = vsel %vm1284_vm8, %v1205_v60, -inf  ;;  %v1000_v14 = vadd.f32 %v986_v36, %v3010_v44 }
 0x177   : > { %v1326_v6 = vmax.f32 %v1324_v41, %v1325_v0  ;;  %v1333_v11 = vmax.f32 %v1331_v58, %v1332_v3  ;;  %v1342_v17 = vrot.slane %v1341_v13, 4  ;;  %v1348_v16 = vsel %vm1284_vm8, %v1242_v29, -inf }
 0x178   : > { %v3067_v15 = vsel %vm1509_vm10, %v1319_v2, -inf  ;;  %v1355_v19 = vsel %vm1284_vm8, %v1243_v20, -inf  ;;  %v1340_v22 = vmax.f32 %v1338_v30, %v1339_v12  ;;  %v1349_v21 = vrot.slane %v1348_v16, 4  ;;  %v1045_v59 = vpop.f32.mrf.mxu2 }
 0x179   : > { %v3072_v32 = vsel %vm1509_vm10, %v1326_v6, -inf  ;;  %v1356_v33 = vrot.slane %v1355_v19, 4  ;;  %v1343_v34 = vmax.f32 %v1341_v13, %v1342_v17  ;;  %v1362_v31 = vsel %vm1284_vm8, %v1244_v8, -inf  ;;  %v1173_v8 = vpop.f32.mrf.mxu0 }
 0x17a   : > { %v1198_v23 = vadd.f32 %v3021_v18, %v1186_v1  ;;  %v1057_v44 = vadd.f32 %v1043_v9, %v1000_v14  ;;  %v3077_v39 = vsel %vm1509_vm10, %v1333_v11, -inf  ;;  %v1350_v40 = vmax.f32 %v1348_v16, %v1349_v21  ;;  %v1113_v14 = vpop.f32.mrf.mxu3  ;;  %v991_v17 = vpop.f32.mrf.mxu1 }
 0x17b   : > { %v1357_v42 = vmax.f32 %v1355_v19, %v1356_v33  ;;  %v1363_v43 = vrot.slane %v1362_v31, 4  ;;  %v3080_v45 = vsel %vm1509_vm10, %v1340_v22, -inf  ;;  %v1344_v5 = vrot.slane %v1343_v34, 2 }
 0x17c   : > { %v1206_v24 = vmax.f32 %v1198_v23, 0.0  ;;  %v3082_v25 = vadd.f32 %v1111_v37, %v1057_v44  ;;  %v1351_v26 = vrot.slane %v1350_v40, 2  ;;  %v3085_v27 = vadd.f32 %v988_v38, %v3012_v52 }
 0x17d   : > { %v1358_v35 = vrot.slane %v1357_v42, 2  ;;  %v1364_v46 = vmax.f32 %v1362_v31, %v1363_v43  ;;  %v1345_v48 = vmax.f32 %v1343_v34, %v1344_v5 }
 0x17e   : > { %v1214_v49 = vpack.c.bf16 %v1206_v24, %v1206_v24  ;;  %v1245_v50 = vrot.slane %v1206_v24, 2  ;;  %v1246_v36 = vrot.slane %v1206_v24, 4  ;;  %v1352_v51 = vmax.f32 %v1350_v40, %v1351_v26 }
 0x17f   : > { %v1359_v53 = vmax.f32 %v1357_v42, %v1358_v35  ;;  %v1365_v10 = vrot.slane %v1364_v46, 2  ;;  %v1247_v28 = vrot.slane %v1206_v24, 6  ;;  %v1346_v41 = vrot.slane %v1345_v48, 1 }
 0x180   : > { %1223 = vst.msk [vmem:[%s3031_s15 + $0xc] sm:$0xf] %vm1219_vm9, %v1214_v49  ;;  %v1369_v56 = vsel %vm1284_vm8, %v1206_v24, -inf  ;;  %v1376_v57 = vsel %vm1284_vm8, %v1245_v50, -inf  ;;  %v1383_v58 = vsel %vm1284_vm8, %v1246_v36, -inf  ;;  %v1353_v52 = vrot.slane %v1352_v51, 1  ;;  %v1048_v50 = vpop.f32.mrf.mxu2 }
 0x181   : > { %v1360_v60 = vrot.slane %v1359_v53, 1  ;;  %v1366_v61 = vmax.f32 %v1364_v46, %v1365_v10  ;;  %v1370_v0 = vrot.slane %v1369_v56, 4  ;;  %v1347_v1 = vmax.f32 %v1345_v48, %v1346_v41 }
 0x182   : > { %v1377_v2 = vrot.slane %v1376_v57, 4  ;;  %v1384_v3 = vrot.slane %v1383_v58, 4  ;;  %v1390_v30 = vsel %vm1284_vm8, %v1247_v28, -inf  ;;  %v1354_v4 = vmax.f32 %v1352_v51, %v1353_v52 }
 0x183   : > { %v1361_v6 = vmax.f32 %v1359_v53, %v1360_v60  ;;  %v1367_v29 = vrot.slane %v1366_v61, 1  ;;  %v1371_v20 = vmax.f32 %v1369_v56, %v1370_v0  ;;  %v1511_v9 = vsel %vm1509_vm10, %v1347_v1, -inf }
 0x184   : > { %v1378_v11 = vmax.f32 %v1376_v57, %v1377_v2  ;;  %v1385_v12 = vmax.f32 %v1383_v58, %v1384_v3  ;;  %v1391_v13 = vrot.slane %v1390_v30, 4  ;;  %v1512_v19 = vmax.f32 %v3051_v54, %v1511_v9  ;;  %v1116_v3 = vpop.f32.mrf.mxu3 }
 0x185   : > { %v1368_v16 = vmax.f32 %v1366_v61, %v1367_v29  ;;  %v1514_v22 = vsel %vm1509_vm10, %v1354_v4, -inf  ;;  %v1517_v21 = vsel %vm1509_vm10, %v1361_v6, -inf  ;;  %v1372_v31 = vrot.slane %v1371_v20, 2  ;;  %v1175_v61 = vpop.f32.mrf.mxu0 }
 0x186   : > { %v1515_v33 = vmax.f32 %v3054_v55, %v1514_v22  ;;  %v1518_v34 = vmax.f32 %v3057_v62, %v1517_v21  ;;  %v1379_v23 = vrot.slane %v1378_v11, 2  ;;  %v1558_v37 = vpack.c.bf16 %v1512_v19, %v1512_v19 }
 0x187   : > { %v1520_v44 = vsel %vm1509_vm10, %v1368_v16, -inf  ;;  %v1386_v38 = vrot.slane %v1385_v12, 2  ;;  %v1392_v40 = vmax.f32 %v1390_v30, %v1391_v13  ;;  %v1373_v54 = vmax.f32 %v1371_v20, %v1372_v31  ;;  %v993_v30 = vpop.f32.mrf.mxu1 }
 0x188   : > { %v1521_v42 = vmax.f32 %v3060_v63, %v1520_v44  ;;  %v1559_v43 = vpack.c.bf16 %v1515_v33, %v1515_v33  ;;  %v1560_v5 = vpack.c.bf16 %v1518_v34, %v1518_v34  ;;  %v1590_v24 = vunpack.c.l.b16 %v1558_v37 }
 0x189   : > { %v1380_v26 = vmax.f32 %v1378_v11, %v1379_v23  ;;  %v1387_v35 = vmax.f32 %v1385_v12, %v1386_v38  ;;  %v1393_v46 = vrot.slane %v1392_v40, 2  ;;  %v1374_v62 = vrot.slane %v1373_v54, 1 }
 0x18a   : > { %v1561_v48 = vpack.c.bf16 %v1521_v42, %v1521_v42  ;;  %v1591_v55 = vunpack.c.l.b16 %v1559_v43  ;;  %v1592_v49 = vunpack.c.l.b16 %v1560_v5  ;;  %v1187_v10 = vadd.f32 %v1173_v8, %v3082_v25 }
 0x18b   : > { %v1381_v36 = vrot.slane %v1380_v26, 1  ;;  %v1388_v51 = vrot.slane %v1387_v35, 1  ;;  %v1394_v53 = vmax.f32 %v1392_v40, %v1393_v46  ;;  %v1375_v41 = vmax.f32 %v1373_v54, %v1374_v62 }
 0x18c   : > { %v3102_v28 = vunpack.c.l.b16 %v1561_v48  ;;  %v1607_v63 = vsel %vm1606_vm11, %v1591_v55, %v1590_v24  ;;  %v1058_v56 = vadd.f32 %v1045_v59, %v3085_v27  ;;  %v1199_v1 = vadd.f32 %v3021_v18, %v1187_v10  ;;  %v1118_v62 = vpop.f32.mrf.mxu3 }
 0x18d   : > { %v3107_v57 = vsel %vm1608_vm12, %v1592_v49, %v1607_v63  ;;  %v1382_v58 = vmax.f32 %v1380_v26, %v1381_v36  ;;  %v1389_v52 = vmax.f32 %v1387_v35, %v1388_v51  ;;  %v1395_v60 = vrot.slane %v1394_v53, 1  ;;  %v1178_v49 = vpop.f32.mrf.mxu0 }
 0x18e   : > { %v1523_v0 = vsel %vm1509_vm10, %v1375_v41, -inf  ;;  %v1126_v2 = vadd.f32 %v1113_v14, %v1058_v56  ;;  %v1002_v25 = vadd.f32 %v991_v17, %v3014_v47  ;;  %v1207_v8 = vmax.f32 %v1199_v1, 0.0 }
 0x18f   : > { %v1396_v4 = vmax.f32 %v1394_v53, %v1395_v60  ;;  %v1524_v6 = vmax.f32 %v3067_v15, %v1523_v0  ;;  %v1526_v27 = vsel %vm1509_vm10, %v1382_v58, -inf  ;;  %v1529_v59 = vsel %vm1509_vm10, %v1389_v52, -inf }
 0x190   : > { %v1527_v29 = vmax.f32 %v3072_v32, %v1526_v27  ;;  %v1530_v20 = vmax.f32 %v3077_v39, %v1529_v59  ;;  %v1188_v9 = vadd.f32 %v1175_v61, %v1126_v2  ;;  %v1059_v47 = vadd.f32 %v1048_v50, %v1002_v25 }
 0x191   : > { %v1532_v11 = vsel %vm1509_vm10, %v1396_v4, -inf  ;;  %v1562_v12 = vpack.c.bf16 %v1524_v6, %v1524_v6  ;;  %v1003_v13 = vadd.f32 %v993_v30, %v3016_v7  ;;  %v1215_v16 = vpack.c.bf16 %v1207_v8, %v1207_v8  ;;  %v1050_v7 = vpop.f32.mrf.mxu2 }
 0x192   : > { %v1533_v14 = vmax.f32 %v3080_v45, %v1532_v11  ;;  %v1563_v15 = vpack.c.bf16 %v1527_v29, %v1527_v29  ;;  %v1564_v17 = vpack.c.bf16 %v1530_v20, %v1530_v20  ;;  %v1248_v22 = vrot.slane %v1207_v8, 2 }
 0x193   : > { %v3120_v19 = vunpack.c.l.b16 %v1562_v12  ;;  %v1249_v32 = vrot.slane %v1207_v8, 4  ;;  %v1250_v21 = vrot.slane %v1207_v8, 6  ;;  %1224 = vst.msk [vmem:[%s3031_s15 + $0x10] sm:$0xf] %vm1219_vm9, %v1215_v16  ;;  %v1397_v31 = vsel %vm1284_vm8, %v1207_v8, -inf }
 0x194   : > { %v1565_v39 = vpack.c.bf16 %v1533_v14, %v1533_v14  ;;  %v3122_v33 = vunpack.c.l.b16 %v1563_v15  ;;  %v3124_v34 = vunpack.c.l.b16 %v1564_v17  ;;  %v1398_v23 = vrot.slane %v1397_v31, 4 }
 0x195   : > { %v1404_v45 = vsel %vm1284_vm8, %v1248_v22, -inf  ;;  %v1411_v44 = vsel %vm1284_vm8, %v1249_v32, -inf  ;;  %v1418_v37 = vsel %vm1284_vm8, %v1250_v21, -inf  ;;  %v1200_v43 = vadd.f32 %v3021_v18, %v1188_v9 }
 0x196   : > { %v1405_v38 = vrot.slane %v1404_v45, 4  ;;  %v1412_v40 = vrot.slane %v1411_v44, 4  ;;  %v1419_v42 = vrot.slane %v1418_v37, 4  ;;  %v1399_v5 = vmax.f32 %v1397_v31, %v1398_v23 }
 0x197   : > { %v1127_v54 = vadd.f32 %v1116_v3, %v1059_v47  ;;  %v1060_v24 = vadd.f32 %v1050_v7, %v1003_v13  ;;  %v3133_v26 = vunpack.c.l.b16 %v1565_v39  ;;  %v1208_v55 = vmax.f32 %v1200_v43, 0.0 }
 0x198   : > { %v1406_v35 = vmax.f32 %v1404_v45, %v1405_v38  ;;  %v1413_v46 = vmax.f32 %v1411_v44, %v1412_v40  ;;  %v1420_v48 = vmax.f32 %v1418_v37, %v1419_v42  ;;  %v1400_v50 = vrot.slane %v1399_v5, 2  ;;  %v1180_v37 = vpop.f32.mrf.mxu0 }
 0x199   : > { %v1189_v36 = vadd.f32 %v1178_v49, %v1127_v54  ;;  %v1128_v51 = vadd.f32 %v1118_v62, %v1060_v24  ;;  %v1216_v41 = vpack.c.bf16 %v1208_v55, %v1208_v55  ;;  %v1251_v58 = vrot.slane %v1208_v55, 2 }
 0x19a   : > { %v1407_v53 = vrot.slane %v1406_v35, 2  ;;  %v1414_v10 = vrot.slane %v1413_v46, 2  ;;  %v1421_v63 = vrot.slane %v1420_v48, 2  ;;  %v1401_v56 = vmax.f32 %v1399_v5, %v1400_v50 }
 0x19b   : > { %v1252_v52 = vrot.slane %v1208_v55, 4  ;;  %v1253_v60 = vrot.slane %v1208_v55, 6  ;;  %1225 = vst.msk [vmem:[%s3031_s15 + $0x14] sm:$0xf] %vm1219_vm9, %v1216_v41  ;;  %v1425_v2 = vsel %vm1284_vm8, %v1208_v55, -inf  ;;  %v1432_v30 = vsel %vm1284_vm8, %v1251_v58, -inf }
 0x19c   : > { %v1408_v61 = vmax.f32 %v1406_v35, %v1407_v53  ;;  %v1415_v0 = vmax.f32 %v1413_v46, %v1414_v10  ;;  %v1422_v1 = vmax.f32 %v1420_v48, %v1421_v63  ;;  %v1402_v25 = vrot.slane %v1401_v56, 1 }
 0x19d   : > { %v1426_v3 = vrot.slane %v1425_v2, 4  ;;  %v1439_v4 = vsel %vm1284_vm8, %v1252_v52, -inf  ;;  %v1433_v29 = vrot.slane %v1432_v30, 4  ;;  %v1446_v11 = vsel %vm1284_vm8, %v1253_v60, -inf }
 0x19e   : > { %v1409_v6 = vrot.slane %v1408_v61, 1  ;;  %v1416_v27 = vrot.slane %v1415_v0, 1  ;;  %v1423_v59 = vrot.slane %v1422_v1, 1  ;;  %v1403_v20 = vmax.f32 %v1401_v56, %v1402_v25 }
 0x19f   : > { %v1427_v8 = vmax.f32 %v1425_v2, %v1426_v3  ;;  %v1440_v9 = vrot.slane %v1439_v4, 4  ;;  %v1434_v14 = vmax.f32 %v1432_v30, %v1433_v29  ;;  %v1447_v22 = vrot.slane %v1446_v11, 4 }
 0x1a0   : > { %v1410_v12 = vmax.f32 %v1408_v61, %v1409_v6  ;;  %v1417_v47 = vmax.f32 %v1415_v0, %v1416_v27  ;;  %v1424_v13 = vmax.f32 %v1422_v1, %v1423_v59  ;;  %v3144_v15 = vsel %vm1509_vm10, %v1403_v20, -inf }
 0x1a1   : > { %v1428_v17 = vrot.slane %v1427_v8, 2  ;;  %v1441_v16 = vmax.f32 %v1439_v4, %v1440_v9  ;;  %v1435_v31 = vrot.slane %v1434_v14, 2  ;;  %v1448_v45 = vmax.f32 %v1446_v11, %v1447_v22 }
 0x1a2   : > { %v3147_v32 = vsel %vm1509_vm10, %v1410_v12, -inf  ;;  %v3150_v21 = vsel %vm1509_vm10, %v1417_v47, -inf  ;;  %v3153_v39 = vsel %vm1509_vm10, %v1424_v13, -inf  ;;  %v1201_v44 = vadd.f32 %v3021_v18, %v1189_v36 }
 0x1a3   : > { %v1429_v7 = vmax.f32 %v1427_v8, %v1428_v17  ;;  %v1442_v23 = vrot.slane %v1441_v16, 2  ;;  %v1436_v38 = vmax.f32 %v1434_v14, %v1435_v31  ;;  %v1190_v40 = vadd.f32 %v1180_v37, %v1128_v51 }
 0x1a4   : > { %v1611_v42 = vsel %vm1610_vm13, %v3102_v28, %v3107_v57  ;;  %v1449_v54 = vrot.slane %v1448_v45, 2  ;;  %v1209_v24 = vmax.f32 %v1201_v44, 0.0 }
 0x1a5   : > { %v1430_v43 = vrot.slane %v1429_v7, 1  ;;  %v1443_v5 = vmax.f32 %v1441_v16, %v1442_v23  ;;  %v1437_v35 = vrot.slane %v1436_v38, 1  ;;  %v1202_v46 = vadd.f32 %v3021_v18, %v1190_v40 }
 0x1a6   : > { %v1613_v48 = vsel %vm1612_vm14, %v3120_v19, %v1611_v42  ;;  %v1450_v62 = vmax.f32 %v1448_v45, %v1449_v54  ;;  %v1217_v50 = vpack.c.bf16 %v1209_v24, %v1209_v24  ;;  %v1254_v57 = vrot.slane %v1209_v24, 2 }
 0x1a7   : > { %v1431_v55 = vmax.f32 %v1429_v7, %v1430_v43  ;;  %v1444_v49 = vrot.slane %v1443_v5, 1  ;;  %v1438_v28 = vmax.f32 %v1436_v38, %v1437_v35  ;;  %v1255_v36 = vrot.slane %v1209_v24, 4 }
 0x1a8   : > { %v1256_v51 = vrot.slane %v1209_v24, 6  ;;  %v1451_v53 = vrot.slane %v1450_v62, 1  ;;  %1226 = vst.msk [vmem:[%s3031_s15 + $0x18] sm:$0xf] %vm1219_vm9, %v1217_v50  ;;  %v1453_v10 = vsel %vm1284_vm8, %v1209_v24, -inf  ;;  %v1460_v56 = vsel %vm1284_vm8, %v1254_v57, -inf }
 0x1a9   : > { %v1445_v18 = vmax.f32 %v1443_v5, %v1444_v49  ;;  %v3168_v19 = vsel %vm1509_vm10, %v1431_v55, -inf  ;;  %v3174_v63 = vsel %vm1509_vm10, %v1438_v28, -inf  ;;  %v1454_v41 = vrot.slane %v1453_v10, 4 }
 0x1aa   : > { %v1467_v58 = vsel %vm1284_vm8, %v1255_v36, -inf  ;;  %v1452_v52 = vmax.f32 %v1450_v62, %v1451_v53  ;;  %v1461_v61 = vrot.slane %v1460_v56, 4  ;;  %v1474_v2 = vsel %vm1284_vm8, %v1256_v51, -inf }
 0x1ab   : > { %v3180_v60 = vsel %vm1509_vm10, %v1445_v18, -inf  ;;  %v1468_v0 = vrot.slane %v1467_v58, 4  ;;  %v1455_v1 = vmax.f32 %v1453_v10, %v1454_v41  ;;  %v1210_v25 = vmax.f32 %v1202_v46, 0.0 }
 0x1ac   : > { %v3186_v3 = vsel %vm1614_vm15, %v3122_v33, %v1613_v48  ;;  %v3189_v30 = vsel %vm1509_vm10, %v1452_v52, -inf  ;;  %v1462_v4 = vmax.f32 %v1460_v56, %v1461_v61  ;;  %v1475_v27 = vrot.slane %v1474_v2, 4 }
 0x1ad   : > { %v1469_v6 = vmax.f32 %v1467_v58, %v1468_v0  ;;  %v1456_v59 = vrot.slane %v1455_v1, 2  ;;  %v1218_v29 = vpack.c.bf16 %v1210_v25, %v1210_v25  ;;  %v1257_v20 = vrot.slane %v1210_v25, 2 }
 0x1ae   : > { %v1258_v8 = vrot.slane %v1210_v25, 4  ;;  %v1463_v9 = vrot.slane %v1462_v4, 2  ;;  %v1476_v11 = vmax.f32 %v1474_v2, %v1475_v27  ;;  %v1259_v12 = vrot.slane %v1210_v25, 6 }
 0x1af   : > { %v1470_v33 = vrot.slane %v1469_v6, 2  ;;  %v1457_v47 = vmax.f32 %v1455_v1, %v1456_v59  ;;  %1227 = vst.msk [vmem:[%s3031_s15 + $0x1c] sm:$0xf] %vm1219_vm9, %v1218_v29  ;;  %v1481_v13 = vsel %vm1284_vm8, %v1210_v25, -inf  ;;  %v1488_v14 = vsel %vm1284_vm8, %v1257_v20, -inf }
 0x1b0   : > { %v1495_v17 = vsel %vm1284_vm8, %v1258_v8, -inf  ;;  %v1464_v16 = vmax.f32 %v1462_v4, %v1463_v9  ;;  %v1477_v31 = vrot.slane %v1476_v11, 2  ;;  %v1482_v7 = vrot.slane %v1481_v13, 4 }
 0x1b1   : > { %v1471_v22 = vmax.f32 %v1469_v6, %v1470_v33 }
 0x1b2   : > { %2364 = shalt.err (!%p2361_p13)
}
 0x1b3   : > { %s2532_s5 = smov 64   ;;  %s2533_s15 = smov 4   ;;  %v1458_v23 = vrot.slane %v1457_v47, 1  ;;  %v1489_v45 = vrot.slane %v1488_v14, 4  ;;  %v1496_v44 = vrot.slane %v1495_v17, 4  ;;  %v1502_v37 = vsel %vm1284_vm8, %v1259_v12, -inf }
 0x1b4   : > { %2070 = dma.vmem_to_hbm [thread:$0]  (%p2754_p10), %s3191_s11, 512, %s3193_s20, %s1634_s18, %s2532_s5, %s2532_s5, %s2533_s15   ;;  %v1465_v38 = vrot.slane %v1464_v16, 1  ;;  %v1472_v40 = vrot.slane %v1471_v22, 1  ;;  %v1478_v42 = vmax.f32 %v1476_v11, %v1477_v31  ;;  %v1483_v43 = vmax.f32 %v1481_v13, %v1482_v7 }
 0x1b5   : > { %v1459_v5 = vmax.f32 %v1457_v47, %v1458_v23  ;;  %v1490_v54 = vmax.f32 %v1488_v14, %v1489_v45  ;;  %v1497_v24 = vmax.f32 %v1495_v17, %v1496_v44  ;;  %v1503_v35 = vrot.slane %v1502_v37, 4  ;;  %s2025_s19 = sshll.u32 %s3386_s9, 1  ;;  %s2026_s30 = sshll.u32 %s3392_s14, 3 }
 0x1b6   : > { %v1466_v46 = vmax.f32 %v1464_v16, %v1465_v38  ;;  %v1473_v48 = vmax.f32 %v1471_v22, %v1472_v40  ;;  %v1479_v55 = vrot.slane %v1478_v42, 1  ;;  %v1484_v49 = vrot.slane %v1483_v43, 2  ;;  %s1670_s7 = sadd.s32 %s2026_s30, %s2025_s19  ;;  %s1894_s9 = sshll.u32 %s2817_s4, 3 }
 0x1b7   : > { %v1535_v62 = vsel %vm1509_vm10, %v1459_v5, -inf  ;;  %v1491_v50 = vrot.slane %v1490_v54, 2  ;;  %v1498_v28 = vrot.slane %v1497_v24, 2  ;;  %v1504_v57 = vmax.f32 %v1502_v37, %v1503_v35  ;;  %s2027_s14 = sshll.u32 %s1670_s7, 2  ;;  %s3396_s12 = sld [smem:[#allocation39_spill]] }
 0x1b8   : > { %v1480_v36 = vmax.f32 %v1478_v42, %v1479_v55  ;;  %v1536_v51 = vmax.f32 %v3144_v15, %v1535_v62  ;;  %v1538_v18 = vsel %vm1509_vm10, %v1466_v46, -inf  ;;  %v1541_v53 = vsel %vm1509_vm10, %v1473_v48, -inf  ;;  %s433_s24 = scalar_lea.vmem [#allocation11], %s1894_s9  ;;  %s1639_s18 = scalar_lea.sflag [#allocation12], %s2817_s4 }
 0x1b9   : > { %v1539_v10 = vmax.f32 %v3147_v32, %v1538_v18  ;;  %v1542_v41 = vmax.f32 %v3150_v21, %v1541_v53  ;;  %v1485_v56 = vmax.f32 %v1483_v43, %v1484_v49  ;;  %v1492_v58 = vmax.f32 %v1490_v54, %v1491_v50  ;;  %s1673_s11 = sshll.u32 %s433_s24, 4  ;;  %s1674_s11 = int_to_ptr.vmem [resolvable:$true] %s1673_s11 }
 0x1ba   : > { %v1544_v52 = vsel %vm1509_vm10, %v1480_v36, -inf  ;;  %v1566_v61 = vpack.c.bf16 %v1536_v51, %v1536_v51  ;;  %v1499_v0 = vmax.f32 %v1497_v24, %v1498_v28  ;;  %v1505_v1 = vrot.slane %v1504_v57, 2 }
 0x1bb   : > { %v1545_v2 = vmax.f32 %v3153_v39, %v1544_v52  ;;  %v1567_v25 = vpack.c.bf16 %v1539_v10, %v1539_v10  ;;  %v1568_v15 = vpack.c.bf16 %v1542_v41, %v1542_v41  ;;  %v1486_v4 = vrot.slane %v1485_v56, 1 }
 0x1bc   : > { %v1598_v6 = vunpack.c.l.b16 %v1566_v61  ;;  %v1493_v27 = vrot.slane %v1492_v58, 1  ;;  %v1500_v32 = vrot.slane %v1499_v0, 1  ;;  %v1506_v59 = vmax.f32 %v1504_v57, %v1505_v1 }
 0x1bd   : > { %v1569_v21 = vpack.c.bf16 %v1545_v2, %v1545_v2  ;;  %v1599_v29 = vunpack.c.l.b16 %v1567_v25  ;;  %v1600_v20 = vunpack.c.l.b16 %v1568_v15  ;;  %v1487_v8 = vmax.f32 %v1485_v56, %v1486_v4  ;;  %s1672_s27 = scalar_lea.hbm %s3396_s12, %s2027_s14  ;;  %s2385_s0 = scalar_lea.hbm %s3396_s12, 64 }
 0x1be   : > { %v1494_v9 = vmax.f32 %v1492_v58, %v1493_v27  ;;  %v1501_v33 = vmax.f32 %v1499_v0, %v1500_v32  ;;  %v1507_v11 = vrot.slane %v1506_v59, 1  ;;  %vm1616_vm0 = vcmask 1046534   ;;  %s1675_s20 = sshll.u32 %s1672_s27, 4  ;;  %s1676_s20 = int_to_ptr.hbm [resolvable:$true] %s1675_s20 }
 0x1bf   : > { %v1601_v39 = vunpack.c.l.b16 %v1569_v21  ;;  %v1620_v12 = vsel %vm1606_vm11, %v1599_v29, %v1598_v6  ;;  %v1547_v47 = vsel %vm1509_vm10, %v1487_v8, -inf  ;;  %v1617_v13 = vsel %vm1616_vm0, %v3124_v34, %v3186_v3  ;;  %s2379_s3 = sshra.s32 %s1676_s20, 4  ;;  %s2380_s3 = int_to_ptr.hbm [resolvable:$true] %s2379_s3 }
 0x1c0   : > { %v1621_v14 = vsel %vm1608_vm12, %v1600_v20, %v1620_v12  ;;  %v1508_v17 = vmax.f32 %v1506_v59, %v1507_v11  ;;  %v1548_v16 = vmax.f32 %v3168_v19, %v1547_v47  ;;  %v1550_v22 = vsel %vm1509_vm10, %v1494_v9, -inf  ;;  %s2381_s2 = scalar_lea.hbm %s2380_s3, 8  ;;  %p2386_p11 = scmp.lt.s32.totalorder %s2380_s3, %s3396_s12 }
 0x1c1   : > { %v1551_v31 = vmax.f32 %v3174_v63, %v1550_v22  ;;  %v1553_v7 = vsel %vm1509_vm10, %v1501_v33, -inf  ;;  %vm1618_vm1 = vcmask 1047559   ;;  %v1622_v23 = vsel %vm1610_vm13, %v1601_v39, %v1621_v14  ;;  %p2382_p8 = scmp.ne.s32.totalorder %s2380_s3, %s2381_s2  ;;  %p2387_p12 = scmp.lt.s32.totalorder %s2385_s0, %s2381_s2 }
 0x1c2   : > { %v1554_v45 = vmax.f32 %v3180_v60, %v1553_v7  ;;  %v1556_v44 = vsel %vm1509_vm10, %v1508_v17, -inf  ;;  %v1570_v34 = vpack.c.bf16 %v1548_v16, %v1548_v16  ;;  %v1619_v3 = vsel %vm1618_vm1, %v3133_v26, %v1617_v13 }
 0x1c3   : > { %v1557_v19 = vmax.f32 %v3189_v30, %v1556_v44  ;;  %v1571_v37 = vpack.c.bf16 %v1551_v31, %v1551_v31  ;;  %v1627_v38 = vpack.c.b16 %v1619_v3, %v1619_v3  ;;  %p2383_p1 = pnand %p2382_p8, %p2754_p10  ;;  %p2388_p2 = por %p2387_p12, %p2386_p11 }
 0x1c4   : > { %v1572_v40 = vpack.c.bf16 %v1554_v45, %v1554_v45  ;;  %v1602_v63 = vunpack.c.l.b16 %v1570_v34 }
 0x1c5   : > { %v1573_v42 = vpack.c.bf16 %v1557_v19, %v1557_v19  ;;  %v1603_v43 = vunpack.c.l.b16 %v1571_v37  ;;  %1631 = vst.msk [vmem:[%s433_s24] sm:$0xf] %vm1219_vm9, %v1627_v38  ;;  %p2384_p9 = pneg %p2383_p1 }
 0x1c6   : > { %v1604_v60 = vunpack.c.l.b16 %v1572_v40  ;;  %v1623_v5 = vsel %vm1612_vm14, %v1602_v63, %v1622_v23 }
 0x1c7   : > { %v1605_v26 = vunpack.c.l.b16 %v1573_v42  ;;  %v1624_v30 = vsel %vm1614_vm15, %v1603_v43, %v1623_v5  ;;  %p2389_p4 = pnand %p2388_p2, %p2384_p9 }
 0x1c8   : > { %v1625_v54 = vsel %vm1616_vm0, %v1604_v60, %v1624_v30 }
 0x1c9   : > { %v1626_v24 = vsel %vm1618_vm1, %v1605_v26, %v1625_v54 }
 0x1ca   : > { %v1628_v35 = vpack.c.b16 %v1626_v24, %v1626_v24 }
 0x1cc   : > { %1632 = vst.msk [vmem:[%s433_s24 + $0x4] sm:$0xf] %vm1219_vm9, %v1628_v35 }
 0x1cd   : > { %2392 = shalt.err (!%p2389_p4)
}
 0x1ce   : > { %2071 = dma.vmem_to_hbm [thread:$0]  (%p2754_p10), %s1674_s11, 128, %s1676_s20, %s1639_s18, %s2532_s5, %s2532_s5, %s2533_s15  }
 0x1cf PF: > { %s3397_s4 = sld [smem:[#allocation20_spill]]  ;;  %p2098_p5 = scmp.ge.s32.totalorder %s2527_s10, 2 }
 0x1d1   : > { %p2089_p0 = pnand %p2098_p5, %p2758_p6 }
 0x1d3   : > { %p2090_p3 = pneg %p2089_p0 }
 0x1d5   : > { %s1690_s30 = sand.u32 1, %s3397_s4  }
 0x1d6   : > { %s1691_s7 = scalar_lea.sflag [#allocation4], %s1690_s30 }
 0x1d7   : > { %2466 = dma.done.wait (%p2090_p3), %s1691_s7, 512  }
 0x1d8   : > { %2468 = vsyncadd (%p2090_p3), %s1691_s7, 4294966784  ;;  %s1701_s9 = scalar_lea.sflag [#allocation12], %s1690_s30 }
 0x1d9   : > { %2470 = dma.done.wait (%p2090_p3), %s1701_s9, 128  }
 0x1da   : > { %2472 = vsyncadd (%p2090_p3), %s1701_s9, 4294967168  ;;  %s30_s10 = sadd.s32 1, %s2527_s10   ;;  %s3400_s5 = smov %s2800_s21 }
 0x1db   : > { %p3273_p7 = scmp.ge.s32.totalorder %s30_s10, 10   ;;  %s3401_s15 = sld [smem:[#allocation19_spill]] }
 0x1dc   : > { %s3402_s26 = sld [smem:[#allocation29_spill]]  ;;  %s3409_s21 = smov %s2479_s22 }
 0x1dd   : > { %s3403_s14 = sld [smem:[#allocation21_spill]]  ;;  %s3410_s22 = smov %s2483_s23 }
 0x1de   : > { %s3404_s29 = sld [smem:[#allocation30_spill]]  ;;  %s3411_s23 = smov %s3400_s5 }
 0x1df   : > { %s3405_s30 = sld [smem:[#allocation24_spill]]  ;;  %s3412_s24 = smov %s2491_s25 }
 0x1e0   : > { %s3406_s7 = sld [smem:[#allocation25_spill]]  ;;  %s3414_s27 = smov %s2503_s28 }
 0x1e1   : > { %s3407_s8 = sld [smem:[#allocation26_spill]]  ;;  %s3413_s25 = smov %s3401_s15 }
 0x1e2   : > { %s3408_s9 = sld [smem:[#allocation27_spill]]  ;;  %29 = sbr.rel (!%p3273_p7) target bundleno = 23 (0x17), region = 138 }
 0x1e3   : > { %s3415_s28 = smov %s3403_s14 }
 0x1e7   :  { %1707 = vsyncpa [#allocation3], 1 }
 0x1e8   :  { %1709 = vsyncpa [#allocation3 + $0x1], 1 }
 0x1e9   :  { %1710 = vsyncpa [#allocation6], 1 }
 0x1ea   :  { %1712 = vsyncpa [#allocation6 + $0x1], 1 }
 0x1eb   :  { %1713 = vsyncpa [#allocation9], 1 }
 0x1ec   :  { %1714 = vsyncpa [#allocation4], 1 }
 0x1ed   :  { %1716 = vsyncpa [#allocation4 + $0x1], 1 }
 0x1ee   :  { %1717 = vsyncpa [#allocation12], 1 }
 0x1ef   :  { %1719 = vsyncpa [#allocation12 + $0x1], 1 }

</bundles_post_ra>
